<compile_context>
chip_gen: v6e
topology: v6e:2x2x1
jax: 0.10.0
libtpu: 0.0.40
codegen_flags: <defaults>
</compile_context>

<pallas_src>
import functools

import jax
import jax.numpy as jnp
from jax import lax
from jax.experimental import pallas as pl
from jax.experimental.pallas import tpu as pltpu

# ---------------- small synthetic (but lane-dense) Llama config ----------------
VOCAB = 256
HIDDEN = 128                          # multiple of 128 -> lane-dense activations
N_HEADS = 4
HEAD_DIM = HIDDEN // N_HEADS          # 32
N_KV_HEADS = 2
N_GROUPS = N_HEADS // N_KV_HEADS      # 2
N_LAYERS = 2
INTER = 256                           # multiple of 128
RMS_EPS = 1e-5
ROPE_THETA = 10000.0
SEQ = 16                              # total prefill tokens (one sequence)
NUM_SLOTS = 32                        # simplified flat KV-cache slots
DTYPE = jnp.bfloat16                  # model dtype (weights + activations); math in f32

Q_SIZE = N_HEADS * HEAD_DIM           # 128
KV_SIZE = N_KV_HEADS * HEAD_DIM       # 64
QKV_SIZE = Q_SIZE + 2 * KV_SIZE       # 256

MASK_VALUE = -1e30                    # finite f32-safe additive mask
# Per-layer weight block ~290 KB bf16, double-buffered ~0.6 MB + activations; 32 MiB is safe on
# v7x (64 MiB VMEM) as well as v5e/v6e (128 MiB).  Re-derive when scaling the config.
VMEM_LIMIT = 32 * 1024 * 1024


# ---------------- in-kernel helpers (operate on traced values) ----------------
def _rms_normalize(x_f32, w_lowp):
    """RMSNorm in f32; w_lowp is a [1, H] model-dtype weight value."""
    var = jnp.mean(x_f32 * x_f32, axis=-1, keepdims=True)
    return x_f32 * lax.rsqrt(var + RMS_EPS) * w_lowp.astype(jnp.float32)


def _rope_packed(x, cos, sin):
    """GPT-NeoX RoPE on a packed [T, n_heads*head_dim] f32 value.

    rotate_half is built from two FULL-WIDTH rolls + one select (no per-head sub-vreg slices):
      first-half lanes of each head take  -x[j + head_dim/2]
      second-half lanes of each head take  x[j - head_dim/2]
    jnp.roll (static shift) has guaranteed semantics; pltpu.roll would be a single XLU vrot.
    """
    half = HEAD_DIM // 2
    lane = lax.broadcasted_iota(jnp.int32, x.shape, 1)
    is_first_half = (lane % HEAD_DIM) < half
    rot = jnp.where(is_first_half,
                    -jnp.roll(x, -half, axis=-1),
                    jnp.roll(x, half, axis=-1))
    return x * cos + rot * sin


# ---------------- fused all-layers transformer kernel (grid over layers) ----------------
def _llama_stack_kernel(x0_ref, lnw_ref, wqkv_ref, wo_ref, wgu_ref, wd_ref, finw_ref,
                        cosq_ref, sinq_ref, cosk_ref, sink_ref,
                        out_ref, kv_ref, h_scr, r_scr, *, scale):
    l = pl.program_id(0)
    last = pl.num_programs(0) - 1

    # ---- layer 0: load embeddings into the resident f32 hidden/residual scratch ----
    @pl.when(l == 0)
    def _():
        h_scr[...] = x0_ref[...].astype(jnp.float32)
        r_scr[...] = jnp.zeros_like(r_scr)

    # ---- input RMSNorm (+ residual add; residual is exactly zero for layer 0) ----
    res1 = h_scr[...] + r_scr[...]                                   # f32 [T, H]
    normed1 = _rms_normalize(res1, lnw_ref[0:1, :]).astype(DTYPE)

    # ---- fused QKV projection (bf16 MXU, f32 accumulation) ----
    qkv = jnp.dot(normed1, wqkv_ref[...], preferred_element_type=jnp.float32)
    q = _rope_packed(qkv[:, :Q_SIZE], cosq_ref[...], sinq_ref[...])
    k = _rope_packed(qkv[:, Q_SIZE:Q_SIZE + KV_SIZE], cosk_ref[...], sink_ref[...])
    v = qkv[:, Q_SIZE + KV_SIZE:]

    q_bf = q.astype(DTYPE)
    k_bf = k.astype(DTYPE)
    v_bf = v.astype(DTYPE)

    # rotated K and V packed into one lane-dense [T, 2*KV_SIZE] block, one per layer grid step
    kv_ref[...] = jnp.concatenate([k_bf, v_bf], axis=1)

    # ---- causal GQA attention (full T x T tile; fine at SEQ=16, see TODO for real lengths) ----
    t = res1.shape[0]
    row = lax.broadcasted_iota(jnp.int32, (t, t), 0)
    col = lax.broadcasted_iota(jnp.int32, (t, t), 1)
    causal = col <= row

    head_out = []
    for h in range(N_HEADS):
        g = h // N_GROUPS                                            # kv_head_mapping
        q_h = q_bf[:, h * HEAD_DIM:(h + 1) * HEAD_DIM]               # [t, D]
        k_g = k_bf[:, g * HEAD_DIM:(g + 1) * HEAD_DIM]               # [t, D]
        v_g = v_bf[:, g * HEAD_DIM:(g + 1) * HEAD_DIM]               # [t, D]
        s = lax.dot_general(q_h, k_g, (((1,), (1,)), ((), ())),
                            preferred_element_type=jnp.float32) * scale
        s = jnp.where(causal, s, MASK_VALUE)
        m = jnp.max(s, axis=-1, keepdims=True)
        p = jnp.exp(s - m)
        denom = jnp.sum(p, axis=-1, keepdims=True)
        o = jnp.dot(p.astype(DTYPE), v_g, preferred_element_type=jnp.float32) / denom
        head_out.append(o)
    attn = jnp.concatenate(head_out, axis=1).astype(DTYPE)           # [t, Q_SIZE] lane-dense

    # ---- o_proj + residual, post-attention RMSNorm ----
    attn_out = jnp.dot(attn, wo_ref[...], preferred_element_type=jnp.float32)
    res2 = attn_out + res1                                           # f32 residual carry
    normed2 = _rms_normalize(res2, lnw_ref[1:2, :]).astype(DTYPE)

    # ---- SwiGLU MLP with fused gate_up projection ----
    gu = jnp.dot(normed2, wgu_ref[...], preferred_element_type=jnp.float32)
    gate = gu[:, :INTER]
    up = gu[:, INTER:]
    hmid = ((gate * jax.nn.sigmoid(gate)) * up).astype(DTYPE)        # SiLU(gate) * up
    mlp_out = jnp.dot(hmid, wd_ref[...], preferred_element_type=jnp.float32)

    # carry to the next layer grid step (stays resident in VMEM)
    h_scr[...] = mlp_out
    r_scr[...] = res2

    # ---- final RMSNorm fused into the last layer's epilogue ----
    @pl.when(l == last)
    def _():
        out_ref[...] = _rms_normalize(mlp_out + res2, finw_ref[...]).astype(out_ref.dtype)


def llama_stack(hidden0, params, cos_q, sin_q, cos_k, sin_k):
    """One pallas_call = the whole FlashLlamaModel stack (all layers) + final norm."""
    t, h = hidden0.shape
    kernel = functools.partial(_llama_stack_kernel, scale=HEAD_DIM ** -0.5)

    inv = lambda shape: pl.BlockSpec(shape, lambda l: (0,) * len(shape))          # loop-invariant
    per_layer = lambda shape: pl.BlockSpec((None,) + shape, lambda l: (l, 0, 0))  # pick layer l

    in_specs = [
        inv((t, h)),                            # embeddings (read only at l == 0)
        per_layer((2, h)),                      # [input_ln | post_ln] weights
        per_layer((h, QKV_SIZE)),               # wqkv
        per_layer((Q_SIZE, h)),                 # wo
        per_layer((h, 2 * INTER)),              # w_gate_up
        per_layer((INTER, h)),                  # w_down
        inv((1, h)),                            # final norm weight
        inv((t, Q_SIZE)), inv((t, Q_SIZE)),     # cos_q, sin_q (tiled once in the wrapper)
        inv((t, KV_SIZE)), inv((t, KV_SIZE)),   # cos_k, sin_k
    ]
    out_shape = (jax.ShapeDtypeStruct((t, h), DTYPE),                     # final normed hidden
                 jax.ShapeDtypeStruct((N_LAYERS, t, 2 * KV_SIZE), DTYPE)) # per-layer [K | V]
    out_specs = (inv((t, h)),
                 pl.BlockSpec((None, t, 2 * KV_SIZE), lambda l: (l, 0, 0)))

    return pl.pallas_call(
        kernel,
        out_shape=out_shape,
        grid=(N_LAYERS,),
        in_specs=in_specs,
        out_specs=out_specs,
        scratch_shapes=[pltpu.VMEM((t, h), jnp.float32),    # hidden carry
                        pltpu.VMEM((t, h), jnp.float32)],   # residual carry
        compiler_params=pltpu.CompilerParams(
            dimension_semantics=("arbitrary",),             # layers are sequential (carry)
            vmem_limit_bytes=VMEM_LIMIT),
    )(hidden0, params["ln"], params["wqkv"], params["wo"], params["wgu"], params["wd"],
      params["final_norm"], cos_q, sin_q, cos_k, sin_k)


# ---------------- lm_head: vocab-tiled matmul, single K block (K = HIDDEN = 128) ----------------
def _lm_head_kernel(x_ref, w_ref, o_ref):
    o_ref[...] = jnp.dot(x_ref[...], w_ref[...], preferred_element_type=jnp.float32)


def lm_head_matmul(x, w):
    m, k = x.shape
    k2, n = w.shape
    tn = n if n <= 512 else 512
    # TODO(synk): real vocab sizes (e.g. 32000) need cdiv + a masked last tile, and a K-tiled
    # accumulator once HIDDEN no longer fits one block.
    assert k == k2 and n % tn == 0
    return pl.pallas_call(
        _lm_head_kernel,
        out_shape=jax.ShapeDtypeStruct((m, n), jnp.float32),
        grid=(n // tn,),
        in_specs=[pl.BlockSpec((m, k), lambda j: (0, 0)),
                  pl.BlockSpec((k, tn), lambda j: (0, j))],
        out_specs=pl.BlockSpec((m, tn), lambda j: (0, j)),
        compiler_params=pltpu.CompilerParams(
            dimension_semantics=("parallel",),              # megacore-shardable on v7x
            vmem_limit_bytes=VMEM_LIMIT),
    )(x, w)


# ---------------- parameter init (deterministic, synthetic, bf16 weights, stacked layers) -------
def init_params(key):
    def w(k, shape, scale=0.05):
        return (jax.random.normal(k, shape, jnp.float32) * scale).astype(DTYPE)

    ks = jax.random.split(key, 8)
    return {
        "embed": w(ks[0], (VOCAB, HIDDEN)),
        "lm_head": w(ks[1], (HIDDEN, VOCAB)),                       # pre-transposed [in, out]
        "final_norm": (1.0 + 0.1 * jax.random.normal(ks[2], (1, HIDDEN), jnp.float32)).astype(DTYPE),
        "ln": (1.0 + 0.1 * jax.random.normal(ks[3], (N_LAYERS, 2, HIDDEN), jnp.float32)).astype(DTYPE),
        "wqkv": w(ks[4], (N_LAYERS, HIDDEN, QKV_SIZE)),             # columns [q | k | v]
        "wo": w(ks[5], (N_LAYERS, Q_SIZE, HIDDEN)),
        "wgu": w(ks[6], (N_LAYERS, HIDDEN, 2 * INTER)),             # columns [gate | up]
        "wd": w(ks[7], (N_LAYERS, INTER, HIDDEN)),
    }


def get_cos_sin(position_ids):
    inv_freq = 1.0 / (ROPE_THETA ** (jnp.arange(0, HEAD_DIM, 2, dtype=jnp.float32) / HEAD_DIM))
    freqs = position_ids.astype(jnp.float32)[:, None] * inv_freq[None, :]
    return jnp.cos(freqs), jnp.sin(freqs)                           # [T, HEAD_DIM//2] each, f32


# ---------------- full forward (prefill path) ----------------
def flash_llama_forward(params, input_ids, position_ids, kv_cache, slots, lm_head_indices=None):
    t = input_ids.shape[0]
    hidden0 = params["embed"][input_ids]                 # embedding gather (XLA glue)

    # cos/sin tiled ONCE per forward into the packed lane layouts used by every layer.
    cos, sin = get_cos_sin(position_ids)
    cos_full = jnp.concatenate([cos, cos], axis=1)       # [T, HEAD_DIM]
    sin_full = jnp.concatenate([sin, sin], axis=1)
    cos_q = jnp.tile(cos_full, (1, N_HEADS))
    sin_q = jnp.tile(sin_full, (1, N_HEADS))
    cos_k = jnp.tile(cos_full, (1, N_KV_HEADS))
    sin_k = jnp.tile(sin_full, (1, N_KV_HEADS))

    hidden_normed, kv_all = llama_stack(hidden0, params, cos_q, sin_q, cos_k, sin_k)

    # TODO(synk): fuse this reshape_and_cache scatter into the fused kernel via
    # input_output_aliases on the (stacked) cache + SMEM slot indices.
    new_cache = []
    for l in range(N_LAYERS):
        k_new = kv_all[l, :, :KV_SIZE].reshape(t, N_KV_HEADS, HEAD_DIM)
        v_new = kv_all[l, :, KV_SIZE:].reshape(t, N_KV_HEADS, HEAD_DIM)
        new_cache.append((kv_cache[l][0].at[slots].set(k_new),
                          kv_cache[l][1].at[slots].set(v_new)))

    if lm_head_indices is not None:
        hidden_normed = hidden_normed[lm_head_indices]
    logits = lm_head_matmul(hidden_normed, params["lm_head"])
    speculative_logits = None                            # no Medusa / speculative head
    return logits, speculative_logits, new_cache


# ---------------- pure-JAX reference (mirrors the kernel's bf16 cast points) ----------------
def ref_forward(params, input_ids, position_ids):
    f32 = jnp.float32
    cos, sin = get_cos_sin(position_ids)
    cos_f = jnp.concatenate([cos, cos], axis=1)[:, None, :]
    sin_f = jnp.concatenate([sin, sin], axis=1)[:, None, :]

    def rms(x, w):
        var = jnp.mean(x * x, axis=-1, keepdims=True)
        return x * lax.rsqrt(var + RMS_EPS) * w.astype(f32)

    def rope(x, n_heads):
        xh = x.reshape(-1, n_heads, HEAD_DIM)
        x1, x2 = xh[..., :HEAD_DIM // 2], xh[..., HEAD_DIM // 2:]
        rot = jnp.concatenate([-x2, x1], axis=-1)
        return (xh * cos_f + rot * sin_f).reshape(x.shape)

    t = input_ids.shape[0]
    causal = jnp.tril(jnp.ones((t, t), bool))
    h = params["embed"][input_ids].astype(f32)
    r = jnp.zeros_like(h)
    kv_list = []
    for l in range(N_LAYERS):
        res1 = h + r
        n1 = rms(res1, params["ln"][l, 0]).astype(DTYPE)
        qkv = jnp.dot(n1, params["wqkv"][l], preferred_element_type=f32)
        q = rope(qkv[:, :Q_SIZE], N_HEADS).astype(DTYPE)
        k = rope(qkv[:, Q_SIZE:Q_SIZE + KV_SIZE], N_KV_HEADS).astype(DTYPE)
        v = qkv[:, Q_SIZE + KV_SIZE:].astype(DTYPE)
        kv_list.append((k, v))
        outs = []
        for hh in range(N_HEADS):
            g = hh // N_GROUPS
            qh = q[:, hh * HEAD_DIM:(hh + 1) * HEAD_DIM]
            kg = k[:, g * HEAD_DIM:(g + 1) * HEAD_DIM]
            vg = v[:, g * HEAD_DIM:(g + 1) * HEAD_DIM]
            s = jnp.dot(qh, kg.T, preferred_element_type=f32) * (HEAD_DIM ** -0.5)
            s = jnp.where(causal, s, MASK_VALUE)
            p = jnp.exp(s - jnp.max(s, axis=-1, keepdims=True))
            den = jnp.sum(p, axis=-1, keepdims=True)
            outs.append(jnp.dot(p.astype(DTYPE), vg, preferred_element_type=f32) / den)
        attn = jnp.concatenate(outs, axis=1).astype(DTYPE)
        res2 = jnp.dot(attn, params["wo"][l], preferred_element_type=f32) + res1
        n2 = rms(res2, params["ln"][l, 1]).astype(DTYPE)
        gu = jnp.dot(n2, params["wgu"][l], preferred_element_type=f32)
        hm = ((gu[:, :INTER] * jax.nn.sigmoid(gu[:, :INTER])) * gu[:, INTER:]).astype(DTYPE)
        h = jnp.dot(hm, params["wd"][l], preferred_element_type=f32)
        r = res2
    normed = rms(h + r, params["final_norm"]).astype(DTYPE)
    logits = jnp.dot(normed, params["lm_head"], preferred_element_type=f32)
    return logits, kv_list


if __name__ == "__main__":
    key = jax.random.PRNGKey(0)
    pkey, ikey = jax.random.split(key)
    params = init_params(pkey)

    input_ids = jax.random.randint(ikey, (SEQ,), 0, VOCAB, dtype=jnp.int32)
    position_ids = jnp.arange(SEQ, dtype=jnp.int32)
    slots = jnp.arange(SEQ, dtype=jnp.int32)
    kv_cache = [
        (jnp.zeros((NUM_SLOTS, N_KV_HEADS, HEAD_DIM), DTYPE),
         jnp.zeros((NUM_SLOTS, N_KV_HEADS, HEAD_DIM), DTYPE))
        for _ in range(N_LAYERS)
    ]

    logits, spec_logits, new_cache = flash_llama_forward(
        params, input_ids, position_ids, kv_cache, slots, lm_head_indices=None
    )
    jax.block_until_ready(logits)

    assert logits.shape == (SEQ, VOCAB)
    assert spec_logits is None
    assert bool(jnp.all(jnp.isfinite(logits)))

    # Correctness check against a pure-JAX reference with matching bf16 cast points.
    ref_logits, ref_kv = ref_forward(params, input_ids, position_ids)
    err = float(jnp.max(jnp.abs(logits - ref_logits)))
    assert err < 5e-2, f"logits mismatch vs pure-JAX reference: {err}"
    for l in range(N_LAYERS):
        k_ref, v_ref = ref_kv[l]
        k_got = new_cache[l][0][slots].reshape(SEQ, KV_SIZE).astype(jnp.float32)
        v_got = new_cache[l][1][slots].reshape(SEQ, KV_SIZE).astype(jnp.float32)
        assert float(jnp.max(jnp.abs(k_got - k_ref.astype(jnp.float32)))) < 3e-2
        assert float(jnp.max(jnp.abs(v_got - v_ref.astype(jnp.float32)))) < 3e-2

    print("KERNEL_OK")
</pallas_src>

<mosaic_0001>
module attributes {stable_mosaic.version = 11 : i64} {
  func.func @_llama_stack_kernel(%arg0: i32, %arg1: memref<16x128xbf16, #tpu.memory_space<vmem>>, %arg2: memref<1x2x128xbf16, #tpu.memory_space<vmem>>, %arg3: memref<1x128x256xbf16, #tpu.memory_space<vmem>>, %arg4: memref<1x128x128xbf16, #tpu.memory_space<vmem>>, %arg5: memref<1x128x512xbf16, #tpu.memory_space<vmem>>, %arg6: memref<1x256x128xbf16, #tpu.memory_space<vmem>>, %arg7: memref<1x128xbf16, #tpu.memory_space<vmem>>, %arg8: memref<16x128xf32, #tpu.memory_space<vmem>>, %arg9: memref<16x128xf32, #tpu.memory_space<vmem>>, %arg10: memref<16x64xf32, #tpu.memory_space<vmem>>, %arg11: memref<16x64xf32, #tpu.memory_space<vmem>>, %arg12: memref<16x128xbf16, #tpu.memory_space<vmem>>, %arg13: memref<1x16x128xbf16, #tpu.memory_space<vmem>>, %arg14: memref<16x128xf32, #tpu.memory_space<vmem>>, %arg15: memref<16x128xf32, #tpu.memory_space<vmem>>) attributes {dimension_semantics = [#tpu.dimension_semantics<arbitrary>], iteration_bounds = array<i64: 2>, scalar_prefetch = 0 : i64, scratch_operands = 2 : i64, tpu.core_type = #tpu.core_type<tc>, window_params = [{pipeline_mode = #tpu.pipeline_mode<synchronous>, transform_indices = @transform_0, window_bounds = array<i64: 16, 128>}, {transform_indices = @transform_1, window_bounds = array<i64: 1, 2, 128>}, {transform_indices = @transform_2, window_bounds = array<i64: 1, 128, 256>}, {transform_indices = @transform_3, window_bounds = array<i64: 1, 128, 128>}, {transform_indices = @transform_4, window_bounds = array<i64: 1, 128, 512>}, {transform_indices = @transform_5, window_bounds = array<i64: 1, 256, 128>}, {pipeline_mode = #tpu.pipeline_mode<synchronous>, transform_indices = @transform_6, window_bounds = array<i64: 1, 128>}, {pipeline_mode = #tpu.pipeline_mode<synchronous>, transform_indices = @transform_7, window_bounds = array<i64: 16, 128>}, {pipeline_mode = #tpu.pipeline_mode<synchronous>, transform_indices = @transform_8, window_bounds = array<i64: 16, 128>}, {pipeline_mode = #tpu.pipeline_mode<synchronous>, transform_indices = @transform_9, window_bounds = array<i64: 16, 64>}, {pipeline_mode = #tpu.pipeline_mode<synchronous>, transform_indices = @transform_10, window_bounds = array<i64: 16, 64>}, {pipeline_mode = #tpu.pipeline_mode<synchronous>, transform_indices = @transform_11, window_bounds = array<i64: 16, 128>}, {transform_indices = @transform_12, window_bounds = array<i64: 1, 16, 128>}]} {
    %c0_i32 = arith.constant 0 : i32
    %0 = arith.cmpi eq, %arg0, %c0_i32 : i32
    %1 = arith.extui %0 : i1 to i32
    %c0_i32_0 = arith.constant 0 : i32
    %2 = arith.cmpi ne, %1, %c0_i32_0 : i32
    scf.if %2 {
      %c0_85 = arith.constant 0 : index
      %c0_86 = arith.constant 0 : index
      %223 = vector.load %arg1[%c0_85, %c0_86] : memref<16x128xbf16, #tpu.memory_space<vmem>>, vector<16x128xbf16>
      %224 = arith.extf %223 : vector<16x128xbf16> to vector<16x128xf32>
      %c0_87 = arith.constant 0 : index
      %c0_88 = arith.constant 0 : index
      %225 = vector.load %arg14[%c0_87, %c0_88] : memref<16x128xf32, #tpu.memory_space<vmem>>, vector<16x128xf32>
      tpu.vector_store %arg14[%c0_87, %c0_88], %224 {strides = array<i32>} : memref<16x128xf32, #tpu.memory_space<vmem>>, vector<16x128xf32>,
      %cst_89 = arith.constant 0.000000e+00 : f32
      %226 = vector.broadcast %cst_89 : f32 to vector<16x128xf32>
      %c0_90 = arith.constant 0 : index
      %c0_91 = arith.constant 0 : index
      %227 = vector.load %arg15[%c0_90, %c0_91] : memref<16x128xf32, #tpu.memory_space<vmem>>, vector<16x128xf32>
      tpu.vector_store %arg15[%c0_90, %c0_91], %226 {strides = array<i32>} : memref<16x128xf32, #tpu.memory_space<vmem>>, vector<16x128xf32>,
    } else {
    }
    %c0 = arith.constant 0 : index
    %c0_1 = arith.constant 0 : index
    %3 = vector.load %arg14[%c0, %c0_1] : memref<16x128xf32, #tpu.memory_space<vmem>>, vector<16x128xf32>
    %c0_2 = arith.constant 0 : index
    %c0_3 = arith.constant 0 : index
    %4 = vector.load %arg15[%c0_2, %c0_3] : memref<16x128xf32, #tpu.memory_space<vmem>>, vector<16x128xf32>
    %5 = arith.addf %3, %4 : vector<16x128xf32>
    %c0_4 = arith.constant 0 : index
    %c0_5 = arith.constant 0 : index
    %c0_6 = arith.constant 0 : index
    %6 = vector.load %arg2[%c0_4, %c0_5, %c0_6] : memref<1x2x128xbf16, #tpu.memory_space<vmem>>, vector<1x1x128xbf16>
    %7 = vector.shape_cast %6 : vector<1x1x128xbf16> to vector<1x128xbf16>
    %8 = arith.mulf %5, %5 : vector<16x128xf32>
    %cst = arith.constant dense<0.000000e+00> : vector<16xf32>
    %9 = vector.multi_reduction <add>, %8, %cst [1] : vector<16x128xf32> to vector<16xf32>
    %10 = vector.shape_cast %9 : vector<16xf32> to vector<16x1xf32>
    %cst_7 = arith.constant 1.280000e+02 : f32
    %11 = vector.broadcast %cst_7 : f32 to vector<16x1xf32>
    %12 = arith.divf %10, %11 : vector<16x1xf32>
    %cst_8 = arith.constant 9.99999974E-6 : f32
    %13 = vector.broadcast %cst_8 : f32 to vector<16x1xf32>
    %14 = arith.addf %12, %13 : vector<16x1xf32>
    %15 = math.rsqrt %14 : vector<16x1xf32>
    %16 = vector.broadcast %15 : vector<16x1xf32> to vector<16x128xf32>
    %17 = arith.mulf %5, %16 : vector<16x128xf32>
    %18 = arith.extf %7 : vector<1x128xbf16> to vector<1x128xf32>
    %19 = vector.broadcast %18 : vector<1x128xf32> to vector<16x128xf32>
    %20 = arith.mulf %17, %19 : vector<16x128xf32>
    %21 = arith.truncf %20 : vector<16x128xf32> to vector<16x128xbf16>
    %c0_9 = arith.constant 0 : index
    %c0_10 = arith.constant 0 : index
    %c0_11 = arith.constant 0 : index
    %22 = vector.load %arg3[%c0_9, %c0_10, %c0_11] : memref<1x128x256xbf16, #tpu.memory_space<vmem>>, vector<1x128x256xbf16>
    %23 = vector.shape_cast %22 : vector<1x128x256xbf16> to vector<128x256xbf16>
    %cst_12 = arith.constant dense<0.000000e+00> : vector<16x256xf32>
    %24 = tpu.matmul %21, %23, %cst_12 {dimension_numbers = #tpu.dot_dimension_numbers<[1], [0], [0], [1], [0, 0, 1, 1], [], []>} : vector<16x128xbf16>, vector<128x256xbf16>, vector<16x256xf32> -> vector<16x256xf32>
    %25 = vector.extract_strided_slice %24 {offsets = [0, 0], sizes = [16, 128], strides = [1, 1]} : vector<16x256xf32> to vector<16x128xf32>
    %c0_13 = arith.constant 0 : index
    %c0_14 = arith.constant 0 : index
    %26 = vector.load %arg8[%c0_13, %c0_14] : memref<16x128xf32, #tpu.memory_space<vmem>>, vector<16x128xf32>
    %c0_15 = arith.constant 0 : index
    %c0_16 = arith.constant 0 : index
    %27 = vector.load %arg9[%c0_15, %c0_16] : memref<16x128xf32, #tpu.memory_space<vmem>>, vector<16x128xf32>
    %28 = tpu.iota {dimensions = array<i32: 1>} : vector<16x128xi32>
    %c32_i32 = arith.constant 32 : i32
    %c0_i32_17 = arith.constant 0 : i32
    %29 = arith.cmpi eq, %c32_i32, %c0_i32_17 : i32
    %c1_i32 = arith.constant 1 : i32
    %30 = arith.select %29, %c1_i32, %c32_i32 : i32
    %31 = vector.broadcast %30 : i32 to vector<16x128xi32>
    %32 = arith.remsi %28, %31 : vector<16x128xi32>
    %c0_i32_18 = arith.constant 0 : i32
    %33 = vector.broadcast %c0_i32_18 : i32 to vector<16x128xi32>
    %34 = arith.cmpi ne, %32, %33 : vector<16x128xi32>
    %c0_i32_19 = arith.constant 0 : i32
    %35 = vector.broadcast %c0_i32_19 : i32 to vector<16x128xi32>
    %36 = arith.cmpi slt, %32, %35 : vector<16x128xi32>
    %c0_i32_20 = arith.constant 0 : i32
    %37 = arith.cmpi slt, %30, %c0_i32_20 : i32
    %38 = vector.broadcast %37 : i1 to vector<16x128xi1>
    %39 = vector.broadcast %38 : vector<16x128xi1> to vector<16x128xi1>
    %40 = arith.xori %36, %39 : vector<16x128xi1>
    %41 = arith.andi %40, %34 : vector<16x128xi1>
    %42 = vector.broadcast %30 : i32 to vector<16x128xi32>
    %43 = arith.addi %32, %42 : vector<16x128xi32>
    %44 = arith.select %41, %43, %32 : vector<16x128xi1>, vector<16x128xi32>
    %c16_i32 = arith.constant 16 : i32
    %45 = vector.broadcast %c16_i32 : i32 to vector<16x128xi32>
    %46 = arith.cmpi slt, %44, %45 : vector<16x128xi32>
    %47 = vector.extract_strided_slice %25 {offsets = [0, 16], sizes = [16, 112], strides = [1, 1]} : vector<16x128xf32> to vector<16x112xf32>
    %48 = vector.extract_strided_slice %25 {offsets = [0, 0], sizes = [16, 16], strides = [1, 1]} : vector<16x128xf32> to vector<16x16xf32>
    %49 = tpu.concatenate %47, %48 in 1 : vector<16x112xf32>, vector<16x16xf32> -> vector<16x128xf32>
    %cst_21 = arith.constant 0.000000e+00 : f32
    %50 = vector.broadcast %cst_21 : f32 to vector<16x128xf32>
    %51 = arith.subf %50, %49 : vector<16x128xf32>
    %52 = vector.extract_strided_slice %25 {offsets = [0, 112], sizes = [16, 16], strides = [1, 1]} : vector<16x128xf32> to vector<16x16xf32>
    %53 = vector.extract_strided_slice %25 {offsets = [0, 0], sizes = [16, 112], strides = [1, 1]} : vector<16x128xf32> to vector<16x112xf32>
    %54 = tpu.concatenate %52, %53 in 1 : vector<16x16xf32>, vector<16x112xf32> -> vector<16x128xf32>
    %55 = arith.select %46, %51, %54 : vector<16x128xi1>, vector<16x128xf32>
    %56 = arith.mulf %25, %26 : vector<16x128xf32>
    %57 = arith.mulf %55, %27 : vector<16x128xf32>
    %58 = arith.addf %56, %57 : vector<16x128xf32>
    %59 = vector.extract_strided_slice %24 {offsets = [0, 128], sizes = [16, 64], strides = [1, 1]} : vector<16x256xf32> to vector<16x64xf32>
    %c0_22 = arith.constant 0 : index
    %c0_23 = arith.constant 0 : index
    %60 = vector.load %arg10[%c0_22, %c0_23] : memref<16x64xf32, #tpu.memory_space<vmem>>, vector<16x64xf32>
    %c0_24 = arith.constant 0 : index
    %c0_25 = arith.constant 0 : index
    %61 = vector.load %arg11[%c0_24, %c0_25] : memref<16x64xf32, #tpu.memory_space<vmem>>, vector<16x64xf32>
    %62 = tpu.iota {dimensions = array<i32: 1>} : vector<16x64xi32>
    %c32_i32_26 = arith.constant 32 : i32
    %c0_i32_27 = arith.constant 0 : i32
    %63 = arith.cmpi eq, %c32_i32_26, %c0_i32_27 : i32
    %c1_i32_28 = arith.constant 1 : i32
    %64 = arith.select %63, %c1_i32_28, %c32_i32_26 : i32
    %65 = vector.broadcast %64 : i32 to vector<16x64xi32>
    %66 = arith.remsi %62, %65 : vector<16x64xi32>
    %c0_i32_29 = arith.constant 0 : i32
    %67 = vector.broadcast %c0_i32_29 : i32 to vector<16x64xi32>
    %68 = arith.cmpi ne, %66, %67 : vector<16x64xi32>
    %c0_i32_30 = arith.constant 0 : i32
    %69 = vector.broadcast %c0_i32_30 : i32 to vector<16x64xi32>
    %70 = arith.cmpi slt, %66, %69 : vector<16x64xi32>
    %c0_i32_31 = arith.constant 0 : i32
    %71 = arith.cmpi slt, %64, %c0_i32_31 : i32
    %72 = vector.broadcast %71 : i1 to vector<16x64xi1>
    %73 = vector.broadcast %72 : vector<16x64xi1> to vector<16x64xi1>
    %74 = arith.xori %70, %73 : vector<16x64xi1>
    %75 = arith.andi %74, %68 : vector<16x64xi1>
    %76 = vector.broadcast %64 : i32 to vector<16x64xi32>
    %77 = arith.addi %66, %76 : vector<16x64xi32>
    %78 = arith.select %75, %77, %66 : vector<16x64xi1>, vector<16x64xi32>
    %c16_i32_32 = arith.constant 16 : i32
    %79 = vector.broadcast %c16_i32_32 : i32 to vector<16x64xi32>
    %80 = arith.cmpi slt, %78, %79 : vector<16x64xi32>
    %81 = vector.extract_strided_slice %59 {offsets = [0, 16], sizes = [16, 48], strides = [1, 1]} : vector<16x64xf32> to vector<16x48xf32>
    %82 = vector.extract_strided_slice %59 {offsets = [0, 0], sizes = [16, 16], strides = [1, 1]} : vector<16x64xf32> to vector<16x16xf32>
    %83 = tpu.concatenate %81, %82 in 1 : vector<16x48xf32>, vector<16x16xf32> -> vector<16x64xf32>
    %cst_33 = arith.constant 0.000000e+00 : f32
    %84 = vector.broadcast %cst_33 : f32 to vector<16x64xf32>
    %85 = arith.subf %84, %83 : vector<16x64xf32>
    %86 = vector.extract_strided_slice %59 {offsets = [0, 48], sizes = [16, 16], strides = [1, 1]} : vector<16x64xf32> to vector<16x16xf32>
    %87 = vector.extract_strided_slice %59 {offsets = [0, 0], sizes = [16, 48], strides = [1, 1]} : vector<16x64xf32> to vector<16x48xf32>
    %88 = tpu.concatenate %86, %87 in 1 : vector<16x16xf32>, vector<16x48xf32> -> vector<16x64xf32>
    %89 = arith.select %80, %85, %88 : vector<16x64xi1>, vector<16x64xf32>
    %90 = arith.mulf %59, %60 : vector<16x64xf32>
    %91 = arith.mulf %89, %61 : vector<16x64xf32>
    %92 = arith.addf %90, %91 : vector<16x64xf32>
    %93 = vector.extract_strided_slice %24 {offsets = [0, 192], sizes = [16, 64], strides = [1, 1]} : vector<16x256xf32> to vector<16x64xf32>
    %94 = arith.truncf %58 : vector<16x128xf32> to vector<16x128xbf16>
    %95 = arith.truncf %92 : vector<16x64xf32> to vector<16x64xbf16>
    %96 = arith.truncf %93 : vector<16x64xf32> to vector<16x64xbf16>
    %97 = tpu.concatenate %95, %96 in 1 : vector<16x64xbf16>, vector<16x64xbf16> -> vector<16x128xbf16>
    %c0_34 = arith.constant 0 : index
    %c0_35 = arith.constant 0 : index
    %c0_36 = arith.constant 0 : index
    %98 = vector.load %arg13[%c0_34, %c0_35, %c0_36] : memref<1x16x128xbf16, #tpu.memory_space<vmem>>, vector<1x16x128xbf16>
    %99 = vector.shape_cast %98 : vector<1x16x128xbf16> to vector<16x128xbf16>
    %100 = vector.shape_cast %97 : vector<16x128xbf16> to vector<1x16x128xbf16>
    tpu.vector_store %arg13[%c0_34, %c0_35, %c0_36], %100 {strides = array<i32>} : memref<1x16x128xbf16, #tpu.memory_space<vmem>>, vector<1x16x128xbf16>,
    %101 = tpu.iota {dimensions = array<i32: 0>} : vector<16x16xi32>
    %102 = tpu.iota {dimensions = array<i32: 1>} : vector<16x16xi32>
    %103 = arith.cmpi sle, %102, %101 : vector<16x16xi32>
    %104 = vector.extract_strided_slice %94 {offsets = [0, 0], sizes = [16, 32], strides = [1, 1]} : vector<16x128xbf16> to vector<16x32xbf16>
    %105 = vector.extract_strided_slice %95 {offsets = [0, 0], sizes = [16, 32], strides = [1, 1]} : vector<16x64xbf16> to vector<16x32xbf16>
    %106 = vector.extract_strided_slice %96 {offsets = [0, 0], sizes = [16, 32], strides = [1, 1]} : vector<16x64xbf16> to vector<16x32xbf16>
    %cst_37 = arith.constant dense<0.000000e+00> : vector<16x16xf32>
    %107 = tpu.matmul %104, %105, %cst_37 {dimension_numbers = #tpu.dot_dimension_numbers<[1], [1], [0], [0], [0, 0, 1, 0], [], []>} : vector<16x32xbf16>, vector<16x32xbf16>, vector<16x16xf32> -> vector<16x16xf32>
    %cst_38 = arith.constant 0.176776692 : f32
    %108 = vector.broadcast %cst_38 : f32 to vector<16x16xf32>
    %109 = arith.mulf %107, %108 : vector<16x16xf32>
    %cst_39 = arith.constant -1.000000e+30 : f32
    %110 = vector.broadcast %cst_39 : f32 to vector<16x16xf32>
    %111 = arith.select %103, %109, %110 : vector<16x16xi1>, vector<16x16xf32>
    %cst_40 = arith.constant dense<0xFF800000> : vector<16xf32>
    %112 = vector.multi_reduction <maximumf>, %111, %cst_40 [1] : vector<16x16xf32> to vector<16xf32>
    %113 = vector.shape_cast %112 : vector<16xf32> to vector<16x1xf32>
    %114 = vector.broadcast %113 : vector<16x1xf32> to vector<16x16xf32>
    %115 = arith.subf %111, %114 : vector<16x16xf32>
    %116 = math.exp %115 : vector<16x16xf32>
    %cst_41 = arith.constant dense<0.000000e+00> : vector<16xf32>
    %117 = vector.multi_reduction <add>, %116, %cst_41 [1] : vector<16x16xf32> to vector<16xf32>
    %118 = vector.shape_cast %117 : vector<16xf32> to vector<16x1xf32>
    %119 = arith.truncf %116 : vector<16x16xf32> to vector<16x16xbf16>
    %cst_42 = arith.constant dense<0.000000e+00> : vector<16x32xf32>
    %120 = tpu.matmul %119, %106, %cst_42 {dimension_numbers = #tpu.dot_dimension_numbers<[1], [0], [0], [1], [0, 0, 1, 1], [], []>} : vector<16x16xbf16>, vector<16x32xbf16>, vector<16x32xf32> -> vector<16x32xf32>
    %121 = vector.broadcast %118 : vector<16x1xf32> to vector<16x32xf32>
    %122 = arith.divf %120, %121 : vector<16x32xf32>
    %123 = vector.extract_strided_slice %94 {offsets = [0, 32], sizes = [16, 32], strides = [1, 1]} : vector<16x128xbf16> to vector<16x32xbf16>
    %124 = vector.extract_strided_slice %95 {offsets = [0, 0], sizes = [16, 32], strides = [1, 1]} : vector<16x64xbf16> to vector<16x32xbf16>
    %125 = vector.extract_strided_slice %96 {offsets = [0, 0], sizes = [16, 32], strides = [1, 1]} : vector<16x64xbf16> to vector<16x32xbf16>
    %cst_43 = arith.constant dense<0.000000e+00> : vector<16x16xf32>
    %126 = tpu.matmul %123, %124, %cst_43 {dimension_numbers = #tpu.dot_dimension_numbers<[1], [1], [0], [0], [0, 0, 1, 0], [], []>} : vector<16x32xbf16>, vector<16x32xbf16>, vector<16x16xf32> -> vector<16x16xf32>
    %cst_44 = arith.constant 0.176776692 : f32
    %127 = vector.broadcast %cst_44 : f32 to vector<16x16xf32>
    %128 = arith.mulf %126, %127 : vector<16x16xf32>
    %cst_45 = arith.constant -1.000000e+30 : f32
    %129 = vector.broadcast %cst_45 : f32 to vector<16x16xf32>
    %130 = arith.select %103, %128, %129 : vector<16x16xi1>, vector<16x16xf32>
    %cst_46 = arith.constant dense<0xFF800000> : vector<16xf32>
    %131 = vector.multi_reduction <maximumf>, %130, %cst_46 [1] : vector<16x16xf32> to vector<16xf32>
    %132 = vector.shape_cast %131 : vector<16xf32> to vector<16x1xf32>
    %133 = vector.broadcast %132 : vector<16x1xf32> to vector<16x16xf32>
    %134 = arith.subf %130, %133 : vector<16x16xf32>
    %135 = math.exp %134 : vector<16x16xf32>
    %cst_47 = arith.constant dense<0.000000e+00> : vector<16xf32>
    %136 = vector.multi_reduction <add>, %135, %cst_47 [1] : vector<16x16xf32> to vector<16xf32>
    %137 = vector.shape_cast %136 : vector<16xf32> to vector<16x1xf32>
    %138 = arith.truncf %135 : vector<16x16xf32> to vector<16x16xbf16>
    %cst_48 = arith.constant dense<0.000000e+00> : vector<16x32xf32>
    %139 = tpu.matmul %138, %125, %cst_48 {dimension_numbers = #tpu.dot_dimension_numbers<[1], [0], [0], [1], [0, 0, 1, 1], [], []>} : vector<16x16xbf16>, vector<16x32xbf16>, vector<16x32xf32> -> vector<16x32xf32>
    %140 = vector.broadcast %137 : vector<16x1xf32> to vector<16x32xf32>
    %141 = arith.divf %139, %140 : vector<16x32xf32>
    %142 = vector.extract_strided_slice %94 {offsets = [0, 64], sizes = [16, 32], strides = [1, 1]} : vector<16x128xbf16> to vector<16x32xbf16>
    %143 = vector.extract_strided_slice %95 {offsets = [0, 32], sizes = [16, 32], strides = [1, 1]} : vector<16x64xbf16> to vector<16x32xbf16>
    %144 = vector.extract_strided_slice %96 {offsets = [0, 32], sizes = [16, 32], strides = [1, 1]} : vector<16x64xbf16> to vector<16x32xbf16>
    %cst_49 = arith.constant dense<0.000000e+00> : vector<16x16xf32>
    %145 = tpu.matmul %142, %143, %cst_49 {dimension_numbers = #tpu.dot_dimension_numbers<[1], [1], [0], [0], [0, 0, 1, 0], [], []>} : vector<16x32xbf16>, vector<16x32xbf16>, vector<16x16xf32> -> vector<16x16xf32>
    %cst_50 = arith.constant 0.176776692 : f32
    %146 = vector.broadcast %cst_50 : f32 to vector<16x16xf32>
    %147 = arith.mulf %145, %146 : vector<16x16xf32>
    %cst_51 = arith.constant -1.000000e+30 : f32
    %148 = vector.broadcast %cst_51 : f32 to vector<16x16xf32>
    %149 = arith.select %103, %147, %148 : vector<16x16xi1>, vector<16x16xf32>
    %cst_52 = arith.constant dense<0xFF800000> : vector<16xf32>
    %150 = vector.multi_reduction <maximumf>, %149, %cst_52 [1] : vector<16x16xf32> to vector<16xf32>
    %151 = vector.shape_cast %150 : vector<16xf32> to vector<16x1xf32>
    %152 = vector.broadcast %151 : vector<16x1xf32> to vector<16x16xf32>
    %153 = arith.subf %149, %152 : vector<16x16xf32>
    %154 = math.exp %153 : vector<16x16xf32>
    %cst_53 = arith.constant dense<0.000000e+00> : vector<16xf32>
    %155 = vector.multi_reduction <add>, %154, %cst_53 [1] : vector<16x16xf32> to vector<16xf32>
    %156 = vector.shape_cast %155 : vector<16xf32> to vector<16x1xf32>
    %157 = arith.truncf %154 : vector<16x16xf32> to vector<16x16xbf16>
    %cst_54 = arith.constant dense<0.000000e+00> : vector<16x32xf32>
    %158 = tpu.matmul %157, %144, %cst_54 {dimension_numbers = #tpu.dot_dimension_numbers<[1], [0], [0], [1], [0, 0, 1, 1], [], []>} : vector<16x16xbf16>, vector<16x32xbf16>, vector<16x32xf32> -> vector<16x32xf32>
    %159 = vector.broadcast %156 : vector<16x1xf32> to vector<16x32xf32>
    %160 = arith.divf %158, %159 : vector<16x32xf32>
    %161 = vector.extract_strided_slice %94 {offsets = [0, 96], sizes = [16, 32], strides = [1, 1]} : vector<16x128xbf16> to vector<16x32xbf16>
    %162 = vector.extract_strided_slice %95 {offsets = [0, 32], sizes = [16, 32], strides = [1, 1]} : vector<16x64xbf16> to vector<16x32xbf16>
    %163 = vector.extract_strided_slice %96 {offsets = [0, 32], sizes = [16, 32], strides = [1, 1]} : vector<16x64xbf16> to vector<16x32xbf16>
    %cst_55 = arith.constant dense<0.000000e+00> : vector<16x16xf32>
    %164 = tpu.matmul %161, %162, %cst_55 {dimension_numbers = #tpu.dot_dimension_numbers<[1], [1], [0], [0], [0, 0, 1, 0], [], []>} : vector<16x32xbf16>, vector<16x32xbf16>, vector<16x16xf32> -> vector<16x16xf32>
    %cst_56 = arith.constant 0.176776692 : f32
    %165 = vector.broadcast %cst_56 : f32 to vector<16x16xf32>
    %166 = arith.mulf %164, %165 : vector<16x16xf32>
    %cst_57 = arith.constant -1.000000e+30 : f32
    %167 = vector.broadcast %cst_57 : f32 to vector<16x16xf32>
    %168 = arith.select %103, %166, %167 : vector<16x16xi1>, vector<16x16xf32>
    %cst_58 = arith.constant dense<0xFF800000> : vector<16xf32>
    %169 = vector.multi_reduction <maximumf>, %168, %cst_58 [1] : vector<16x16xf32> to vector<16xf32>
    %170 = vector.shape_cast %169 : vector<16xf32> to vector<16x1xf32>
    %171 = vector.broadcast %170 : vector<16x1xf32> to vector<16x16xf32>
    %172 = arith.subf %168, %171 : vector<16x16xf32>
    %173 = math.exp %172 : vector<16x16xf32>
    %cst_59 = arith.constant dense<0.000000e+00> : vector<16xf32>
    %174 = vector.multi_reduction <add>, %173, %cst_59 [1] : vector<16x16xf32> to vector<16xf32>
    %175 = vector.shape_cast %174 : vector<16xf32> to vector<16x1xf32>
    %176 = arith.truncf %173 : vector<16x16xf32> to vector<16x16xbf16>
    %cst_60 = arith.constant dense<0.000000e+00> : vector<16x32xf32>
    %177 = tpu.matmul %176, %163, %cst_60 {dimension_numbers = #tpu.dot_dimension_numbers<[1], [0], [0], [1], [0, 0, 1, 1], [], []>} : vector<16x16xbf16>, vector<16x32xbf16>, vector<16x32xf32> -> vector<16x32xf32>
    %178 = vector.broadcast %175 : vector<16x1xf32> to vector<16x32xf32>
    %179 = arith.divf %177, %178 : vector<16x32xf32>
    %180 = tpu.concatenate %122, %141, %160, %179 in 1 : vector<16x32xf32>, vector<16x32xf32>, vector<16x32xf32>, vector<16x32xf32> -> vector<16x128xf32>
    %181 = arith.truncf %180 : vector<16x128xf32> to vector<16x128xbf16>
    %c0_61 = arith.constant 0 : index
    %c0_62 = arith.constant 0 : index
    %c0_63 = arith.constant 0 : index
    %182 = vector.load %arg4[%c0_61, %c0_62, %c0_63] : memref<1x128x128xbf16, #tpu.memory_space<vmem>>, vector<1x128x128xbf16>
    %183 = vector.shape_cast %182 : vector<1x128x128xbf16> to vector<128x128xbf16>
    %cst_64 = arith.constant dense<0.000000e+00> : vector<16x128xf32>
    %184 = tpu.matmul %181, %183, %cst_64 {dimension_numbers = #tpu.dot_dimension_numbers<[1], [0], [0], [1], [0, 0, 1, 1], [], []>} : vector<16x128xbf16>, vector<128x128xbf16>, vector<16x128xf32> -> vector<16x128xf32>
    %185 = arith.addf %184, %5 : vector<16x128xf32>
    %c0_65 = arith.constant 0 : index
    %c1 = arith.constant 1 : index
    %c0_66 = arith.constant 0 : index
    %186 = vector.load %arg2[%c0_65, %c1, %c0_66] : memref<1x2x128xbf16, #tpu.memory_space<vmem>>, vector<1x1x128xbf16>
    %187 = vector.shape_cast %186 : vector<1x1x128xbf16> to vector<1x128xbf16>
    %188 = arith.mulf %185, %185 : vector<16x128xf32>
    %cst_67 = arith.constant dense<0.000000e+00> : vector<16xf32>
    %189 = vector.multi_reduction <add>, %188, %cst_67 [1] : vector<16x128xf32> to vector<16xf32>
    %190 = vector.shape_cast %189 : vector<16xf32> to vector<16x1xf32>
    %cst_68 = arith.constant 1.280000e+02 : f32
    %191 = vector.broadcast %cst_68 : f32 to vector<16x1xf32>
    %192 = arith.divf %190, %191 : vector<16x1xf32>
    %cst_69 = arith.constant 9.99999974E-6 : f32
    %193 = vector.broadcast %cst_69 : f32 to vector<16x1xf32>
    %194 = arith.addf %192, %193 : vector<16x1xf32>
    %195 = math.rsqrt %194 : vector<16x1xf32>
    %196 = vector.broadcast %195 : vector<16x1xf32> to vector<16x128xf32>
    %197 = arith.mulf %185, %196 : vector<16x128xf32>
    %198 = arith.extf %187 : vector<1x128xbf16> to vector<1x128xf32>
    %199 = vector.broadcast %198 : vector<1x128xf32> to vector<16x128xf32>
    %200 = arith.mulf %197, %199 : vector<16x128xf32>
    %201 = arith.truncf %200 : vector<16x128xf32> to vector<16x128xbf16>
    %c0_70 = arith.constant 0 : index
    %c0_71 = arith.constant 0 : index
    %c0_72 = arith.constant 0 : index
    %202 = vector.load %arg5[%c0_70, %c0_71, %c0_72] : memref<1x128x512xbf16, #tpu.memory_space<vmem>>, vector<1x128x512xbf16>
    %203 = vector.shape_cast %202 : vector<1x128x512xbf16> to vector<128x512xbf16>
    %cst_73 = arith.constant dense<0.000000e+00> : vector<16x512xf32>
    %204 = tpu.matmul %201, %203, %cst_73 {dimension_numbers = #tpu.dot_dimension_numbers<[1], [0], [0], [1], [0, 0, 1, 1], [], []>} : vector<16x128xbf16>, vector<128x512xbf16>, vector<16x512xf32> -> vector<16x512xf32>
    %205 = vector.extract_strided_slice %204 {offsets = [0, 0], sizes = [16, 256], strides = [1, 1]} : vector<16x512xf32> to vector<16x256xf32>
    %206 = vector.extract_strided_slice %204 {offsets = [0, 256], sizes = [16, 256], strides = [1, 1]} : vector<16x512xf32> to vector<16x256xf32>
    %207 = arith.negf %205 : vector<16x256xf32>
    %208 = math.exp %207 : vector<16x256xf32>
    %cst_74 = arith.constant 1.000000e+00 : f32
    %209 = vector.broadcast %cst_74 : f32 to vector<16x256xf32>
    %210 = arith.addf %209, %208 : vector<16x256xf32>
    %211 = arith.divf %209, %210 : vector<16x256xf32>
    %212 = arith.mulf %205, %211 : vector<16x256xf32>
    %213 = arith.mulf %212, %206 : vector<16x256xf32>
    %214 = arith.truncf %213 : vector<16x256xf32> to vector<16x256xbf16>
    %c0_75 = arith.constant 0 : index
    %c0_76 = arith.constant 0 : index
    %c0_77 = arith.constant 0 : index
    %215 = vector.load %arg6[%c0_75, %c0_76, %c0_77] : memref<1x256x128xbf16, #tpu.memory_space<vmem>>, vector<1x256x128xbf16>
    %216 = vector.shape_cast %215 : vector<1x256x128xbf16> to vector<256x128xbf16>
    %cst_78 = arith.constant dense<0.000000e+00> : vector<16x128xf32>
    %217 = tpu.matmul %214, %216, %cst_78 {dimension_numbers = #tpu.dot_dimension_numbers<[1], [0], [0], [1], [0, 0, 1, 1], [], []>} : vector<16x256xbf16>, vector<256x128xbf16>, vector<16x128xf32> -> vector<16x128xf32>
    %c0_79 = arith.constant 0 : index
    %c0_80 = arith.constant 0 : index
    %218 = vector.load %arg14[%c0_79, %c0_80] : memref<16x128xf32, #tpu.memory_space<vmem>>, vector<16x128xf32>
    tpu.vector_store %arg14[%c0_79, %c0_80], %217 {strides = array<i32>} : memref<16x128xf32, #tpu.memory_space<vmem>>, vector<16x128xf32>,
    %c0_81 = arith.constant 0 : index
    %c0_82 = arith.constant 0 : index
    %219 = vector.load %arg15[%c0_81, %c0_82] : memref<16x128xf32, #tpu.memory_space<vmem>>, vector<16x128xf32>
    tpu.vector_store %arg15[%c0_81, %c0_82], %185 {strides = array<i32>} : memref<16x128xf32, #tpu.memory_space<vmem>>, vector<16x128xf32>,
    %c1_i32_83 = arith.constant 1 : i32
    %220 = arith.cmpi eq, %arg0, %c1_i32_83 : i32
    %221 = arith.extui %220 : i1 to i32
    %c0_i32_84 = arith.constant 0 : i32
    %222 = arith.cmpi ne, %221, %c0_i32_84 : i32
    scf.if %222 {
      %223 = arith.addf %217, %185 : vector<16x128xf32>
      %c0_85 = arith.constant 0 : index
      %c0_86 = arith.constant 0 : index
      %224 = vector.load %arg7[%c0_85, %c0_86] : memref<1x128xbf16, #tpu.memory_space<vmem>>, vector<1x128xbf16>
      %225 = arith.mulf %223, %223 : vector<16x128xf32>
      %cst_87 = arith.constant dense<0.000000e+00> : vector<16xf32>
      %226 = vector.multi_reduction <add>, %225, %cst_87 [1] : vector<16x128xf32> to vector<16xf32>
      %227 = vector.shape_cast %226 : vector<16xf32> to vector<16x1xf32>
      %cst_88 = arith.constant 1.280000e+02 : f32
      %228 = vector.broadcast %cst_88 : f32 to vector<16x1xf32>
      %229 = arith.divf %227, %228 : vector<16x1xf32>
      %cst_89 = arith.constant 9.99999974E-6 : f32
      %230 = vector.broadcast %cst_89 : f32 to vector<16x1xf32>
      %231 = arith.addf %229, %230 : vector<16x1xf32>
      %232 = math.rsqrt %231 : vector<16x1xf32>
      %233 = vector.broadcast %232 : vector<16x1xf32> to vector<16x128xf32>
      %234 = arith.mulf %223, %233 : vector<16x128xf32>
      %235 = arith.extf %224 : vector<1x128xbf16> to vector<1x128xf32>
      %236 = vector.broadcast %235 : vector<1x128xf32> to vector<16x128xf32>
      %237 = arith.mulf %234, %236 : vector<16x128xf32>
      %238 = arith.truncf %237 : vector<16x128xf32> to vector<16x128xbf16>
      %c0_90 = arith.constant 0 : index
      %c0_91 = arith.constant 0 : index
      %239 = vector.load %arg12[%c0_90, %c0_91] : memref<16x128xbf16, #tpu.memory_space<vmem>>, vector<16x128xbf16>
      tpu.vector_store %arg12[%c0_90, %c0_91], %238 {strides = array<i32>} : memref<16x128xbf16, #tpu.memory_space<vmem>>, vector<16x128xbf16>,
    } else {
    }
    return
  }
  func.func @transform_0(%arg0: i32) -> (i32, i32) {
    %c0_i32 = arith.constant 0 : i32
    %c0_i32_0 = arith.constant 0 : i32
    %c0_i32_1 = arith.constant 0 : i32
    return %c0_i32, %c0_i32_0 : i32, i32
  }
  func.func @transform_1(%arg0: i32) -> (i32, i32, i32) {
    %c0_i32 = arith.constant 0 : i32
    %c0_i32_0 = arith.constant 0 : i32
    %c0_i32_1 = arith.constant 0 : i32
    return %arg0, %c0_i32, %c0_i32_0 : i32, i32, i32
  }
  func.func @transform_2(%arg0: i32) -> (i32, i32, i32) {
    %c0_i32 = arith.constant 0 : i32
    %c0_i32_0 = arith.constant 0 : i32
    %c0_i32_1 = arith.constant 0 : i32
    return %arg0, %c0_i32, %c0_i32_0 : i32, i32, i32
  }
  func.func @transform_3(%arg0: i32) -> (i32, i32, i32) {
    %c0_i32 = arith.constant 0 : i32
    %c0_i32_0 = arith.constant 0 : i32
    %c0_i32_1 = arith.constant 0 : i32
    return %arg0, %c0_i32, %c0_i32_0 : i32, i32, i32
  }
  func.func @transform_4(%arg0: i32) -> (i32, i32, i32) {
    %c0_i32 = arith.constant 0 : i32
    %c0_i32_0 = arith.constant 0 : i32
    %c0_i32_1 = arith.constant 0 : i32
    return %arg0, %c0_i32, %c0_i32_0 : i32, i32, i32
  }
  func.func @transform_5(%arg0: i32) -> (i32, i32, i32) {
    %c0_i32 = arith.constant 0 : i32
    %c0_i32_0 = arith.constant 0 : i32
    %c0_i32_1 = arith.constant 0 : i32
    return %arg0, %c0_i32, %c0_i32_0 : i32, i32, i32
  }
  func.func @transform_6(%arg0: i32) -> (i32, i32) {
    %c0_i32 = arith.constant 0 : i32
    %c0_i32_0 = arith.constant 0 : i32
    %c0_i32_1 = arith.constant 0 : i32
    return %c0_i32, %c0_i32_0 : i32, i32
  }
  func.func @transform_7(%arg0: i32) -> (i32, i32) {
    %c0_i32 = arith.constant 0 : i32
    %c0_i32_0 = arith.constant 0 : i32
    %c0_i32_1 = arith.constant 0 : i32
    return %c0_i32, %c0_i32_0 : i32, i32
  }
  func.func @transform_8(%arg0: i32) -> (i32, i32) {
    %c0_i32 = arith.constant 0 : i32
    %c0_i32_0 = arith.constant 0 : i32
    %c0_i32_1 = arith.constant 0 : i32
    return %c0_i32, %c0_i32_0 : i32, i32
  }
  func.func @transform_9(%arg0: i32) -> (i32, i32) {
    %c0_i32 = arith.constant 0 : i32
    %c0_i32_0 = arith.constant 0 : i32
    %c0_i32_1 = arith.constant 0 : i32
    return %c0_i32, %c0_i32_0 : i32, i32
  }
  func.func @transform_10(%arg0: i32) -> (i32, i32) {
    %c0_i32 = arith.constant 0 : i32
    %c0_i32_0 = arith.constant 0 : i32
    %c0_i32_1 = arith.constant 0 : i32
    return %c0_i32, %c0_i32_0 : i32, i32
  }
  func.func @transform_11(%arg0: i32) -> (i32, i32) {
    %c0_i32 = arith.constant 0 : i32
    %c0_i32_0 = arith.constant 0 : i32
    %c0_i32_1 = arith.constant 0 : i32
    return %c0_i32, %c0_i32_0 : i32, i32
  }
  func.func @transform_12(%arg0: i32) -> (i32, i32, i32) {
    %c0_i32 = arith.constant 0 : i32
    %c0_i32_0 = arith.constant 0 : i32
    %c0_i32_1 = arith.constant 0 : i32
    return %arg0, %c0_i32, %c0_i32_0 : i32, i32, i32
  }
}

</mosaic_0001>

<bundles_post_ra>
// kernel: tpu_custom_call.1
= control target key start
LH: loop header
LB: loop body
LE: loop exit
PB: predicated region body
PF: predicated region fallthrough
CT: control target
= control target key end

     0   :  { %s4126_s0 = inlined_call_operand.hbm [shape: bf16[16,128], index: 0, kind: input, shape index: {}]   ;;  %s4127_s1 = inlined_call_operand.hbm [shape: bf16[2,2,128], index: 1, kind: input, shape index: {}]   ;;  %s4128_s2 = inlined_call_operand.hbm [shape: bf16[2,128,256], index: 2, kind: input, shape index: {}]   ;;  %s4129_s3 = inlined_call_operand.hbm [shape: bf16[2,128,128], index: 3, kind: input, shape index: {}]   ;;  %s4130_s4 = inlined_call_operand.hbm [shape: bf16[2,128,512], index: 4, kind: input, shape index: {}]   ;;  %s4131_s5 = inlined_call_operand.hbm [shape: bf16[2,256,128], index: 5, kind: input, shape index: {}]   ;;  %s4132_s6 = inlined_call_operand.hbm [shape: bf16[1,128], index: 6, kind: input, shape index: {}]   ;;  %s4133_s7 = inlined_call_operand.hbm [shape: f32[16,128], index: 7, kind: input, shape index: {}]   ;;  %s4134_s8 = inlined_call_operand.hbm [shape: f32[16,128], index: 8, kind: input, shape index: {}]   ;;  %s4135_s9 = inlined_call_operand.vmem [shape: f32[16,64], index: 9, kind: input, shape index: {}]   ;;  %s4136_s10 = inlined_call_operand.hbm [shape: f32[16,64], index: 10, kind: input, shape index: {}]   ;;  %s4137_s11 = inlined_call_operand.hbm [shape: bf16[16,128], index: 11, kind: output, shape index: {0}]   ;;  %s4138_s12 = inlined_call_operand.hbm [shape: bf16[2,16,128], index: 12, kind: output, shape index: {1}]  }
   0x1   :  { %4165 = sst [smem:[#allocation39_spill]] %s4127_s1 }
   0x2   :  { %4166 = sst [smem:[#allocation40_spill]] %s4132_s6 }
   0x3   :  { %4167 = sst [smem:[#allocation41_spill]] %s4133_s7 }
   0x4   :  { %4168 = sst [smem:[#allocation42_spill]] %s4137_s11 }
   0x5   :  { %4169 = sst [smem:[#allocation43_spill]] %s4138_s12 }
   0x6   :  { %18 = vsyncpa [#allocation5], 0 }
   0x7   :  { %19 = vsyncpa [#allocation8], 0 }
   0x8   :  { %21 = vsyncpa [#allocation8 + $0x1], 0 }
   0x9   :  { %22 = vsyncpa [#allocation11], 0 }
   0xa   :  { %24 = vsyncpa [#allocation11 + $0x1], 0 }
   0xb   :  { %25 = vsyncpa [#allocation14], 0 }
   0xc   :  { %27 = vsyncpa [#allocation14 + $0x1], 0 }
   0xd   :  { %28 = vsyncpa [#allocation17], 0 }
   0xe   :  { %29 = vsyncpa [#allocation20], 0 }
   0xf   :  { %30 = vsyncpa [#allocation6], 0 }
  0x10   :  { %31 = vsyncpa [#allocation23], 0 }
  0x11   :  { %33 = vsyncpa [#allocation23 + $0x1], 0  ;;  %s3410_s21 = smov 0   ;;  %s3412_s22 = smov 0  }
  0x12   :  { %s3414_s23 = smov 0   ;;  %s3416_s24 = smov 0  }
  0x13 LB: > { %4170 = sst [smem:[#allocation33_spill]] %s3301_s21  ;;  %s3315_s25 = smov [#allocation15]   ;;  %s3313_s24 = sphi %s3416_s24, %s4226_s24   ;;  %s3309_s23 = sphi %s3414_s23, %s4228_s23   ;;  %s3305_s22 = sphi %s3412_s22, %s4230_s22   ;;  %s3301_s21 = sphi %s3410_s21, %s4229_s21  }
  0x14   : > { %4171 = sst [smem:[#allocation34_spill]] %s3309_s23  ;;  %s373_s26 = sshll.u32 %s3315_s25, 4  ;;  %s374_s26 = int_to_ptr.vmem [resolvable:$true] %s373_s26 }
  0x15   : > { %s3431_s27 = sadd.s32 4294967295, %s3313_s24   ;;  %p2355_p0 = scmp.ge.s32.totalorder %s3313_s24, 1 }
  0x16   : > { %p4139_p1 = scmp.eq.s32.totalorder %s3431_s27, 0  ;;  %p347_p2 = scmp.lt.s32.totalorder %s3313_s24, 3 }
  0x17   : > { %s3316_s29 = smov [#allocation16]   ;;  %s2938_s15 = scalar_lea.vmem %s374_s26, 16 }
  0x18   : > { %p3437_p4 = pnand %p2355_p0, %p347_p2  ;;  %s383_s30 = sshll.u32 %s3316_s29, 4  ;;  %s384_s30 = int_to_ptr.vmem [resolvable:$true] %s383_s30 }
  0x19   : > { %p2939_p9 = scmp.ne.s32.totalorder %s374_s26, %s2938_s15  ;;  %s2945_s16 = scalar_lea.vmem %s374_s26, 32 }
  0x1a   : > { %s4172_s28 = scalar_select %p3437_p4, 1, 0 }
  0x1b   : > { %p2650_p6 = pneg %p3437_p4  ;;  %p2946_p12 = scmp.lt.s32.totalorder %s374_s26, %s374_s26 }
  0x1c   : > { %p2947_p13 = scmp.lt.s32.totalorder %s2945_s16, %s2938_s15 }
  0x1d   : > { %p3446_p7 = pnand %p2650_p6, %p4139_p1 }
  0x1e   : > { %p2948_p0 = por %p2947_p13, %p2946_p12 }
  0x1f   : > { %s4173_s13 = scalar_select %p3446_p7, 1, 0 }
  0x20   : > { %p3452_p8 = pneg %p3446_p7 }
  0x22   : > { %s4174_s14 = scalar_select %p3452_p8, 1, 0 }
  0x23   : > { %p2941_p10 = pnand %p2939_p9, %p3452_p8 }
  0x25   : > { %p2942_p11 = pneg %p2941_p10 }
  0x27   : > { %p2949_p2 = pnand %p2948_p0, %p2942_p11 }
  0x29   : > { %2952 = shalt.err (!%p2949_p2)
}
  0x2a   : > { %s4175_s6 = sld [smem:[#allocation40_spill]]  ;;  %s2964_s19 = scalar_lea.vmem %s384_s30, 256 }
  0x2b   : > { %p2965_p6 = scmp.ne.s32.totalorder %s384_s30, %s2964_s19  ;;  %p2972_p9 = scmp.lt.s32.totalorder %s384_s30, %s384_s30 }
  0x2c   : > { %p2973_p10 = scmp.lt.s32.totalorder %s2964_s19, %s2964_s19 }
  0x2d   : > { %p2967_p5 = pnand %p2965_p6, %p3452_p8 }
  0x2e   : > { %p2974_p1 = por %p2973_p10, %p2972_p9 }
  0x2f   : > { %p2968_p3 = pneg %p2967_p5 }
  0x30   : > { %2656 = dma.hbm_to_vmem [thread:$0]  (!%p3446_p7), %s4175_s6, 16, %s374_s26, [#allocation14]  }
  0x31   : > { %p2975_p4 = pnand %p2974_p1, %p2968_p3 }
  0x33   : > { %2978 = shalt.err (!%p2975_p4)
}
  0x34   : > { %s4141_s20 = smov 128   ;;  %s4143_s25 = smov 8  }
  0x35   : > { %s4176_s7 = sld [smem:[#allocation41_spill]]  ;;  %s2354_s15 = sadd.s32 4294967294, %s3313_s24  }
  0x36   : > { %s3475_s16 = sadd.s32 1, %s3313_s24   ;;  %s67_s18 = sadd.s32 1, %s3309_s23 }
  0x37   : > { %4177 = sst [smem:[#allocation35_spill]] %s3475_s16  ;;  %s64_s17 = ssub.s32 %s3313_s24, %s3475_s16 }
  0x38   : > { %p65_p1 = scmp.eq.s32.totalorder %s64_s17, 0  ;;  %p74_p3 = scmp.ne.s32.totalorder %s3309_s23, %s3305_s22 }
  0x39   : > { %p75_p4 = scmp.eq.s32.totalorder %s3313_s24, 0  ;;  %p80_p5 = scmp.ne.s32.totalorder %s3305_s22, %s3301_s21 }
  0x3a   : > { %s3486_s19 = scalar_select %p65_p1, %s3309_s23, %s67_s18  }
  0x3b   : > { %2659 = dma.hbm_to_vmem [thread:$0]  (!%p3446_p7), %s4176_s7, 256, %s384_s30, [#allocation17], %s4141_s20, %s4141_s20, %s4143_s25  }
  0x3c   : > { %4178 = sst [smem:[#allocation36_spill]] %s3486_s19  ;;  %p3488_p11 = por %p75_p4, %p74_p3 }
  0x3d   : > { %p4180_p12 = scmp.eq.s32.totalorder %s3431_s27, 0  ;;  %p4153_p0 = scmp.eq.s32.totalorder %s3431_s27, 1 }
  0x3e   : > { %p340_p2 = scmp.eq.s32.totalorder %s2354_s15, 1  ;;  %p2691_p6 = scmp.lt.s32.totalorder %s3313_s24, 2 }
  0x3f   : > { %p3494_p13 = por %p4180_p12, %p80_p5  ;;  %s3501_s26 = sand.u32 1, %s3313_s24  }
  0x40   : > { %p3505_p9 = por %p4153_p0, %p74_p3  ;;  %p3509_p10 = por %p340_p2, %p80_p5 }
  0x41   : > { %s4181_s30 = scalar_select %p3494_p13, 1, 0 }
  0x42   : > { %s4182_s29 = scalar_select %p3505_p9, 1, 0 }
  0x43   : > { %s4184_s17 = scalar_select %p3509_p10, 1, 0 }
  0x44   : > { %4183 = sst [smem:[#allocation37_spill]] %s4182_s29  ;;  %s3514_s18 = sand.u32 1, %s3309_s23  }
  0x45   : > { %4185 = sst [smem:[#allocation38_spill]] %s4184_s17  ;;  %s2362_s20 = sshll.u32 %s3313_s24, 4 }
  0x46   : > { %s4186_s1 = sld [smem:[#allocation39_spill]]  ;;  %s429_s19 = scalar_lea.vmem [#allocation7], %s3514_s18 }
  0x47   : > { %s436_s16 = sshll.u32 %s429_s19, 4  ;;  %p3527_p1 = pnand %p2691_p6, %p3488_p11  ;;  %s3523_s16 = int_to_ptr.vmem [resolvable:$true] %s436_s16 }
  0x48   : > { %s4160_s12 = scalar_lea.sflag [#allocation8], %s3501_s26 }
  0x49   : > { %p3538_p4 = pneg %p3527_p1 }
  0x4c   : > { %s3520_s7 = scalar_lea.hbm %s4186_s1, %s2362_s20  ;;  %s2984_s19 = scalar_lea.hbm %s4186_s1, 32 }
  0x4d   : > { %s2979_s29 = scalar_lea.hbm %s3520_s7, 16  ;;  %p2985_p11 = scmp.lt.s32.totalorder %s3520_s7, %s4186_s1 }
  0x4e   : > { %p2980_p3 = scmp.ne.s32.totalorder %s3520_s7, %s2979_s29  ;;  %p2986_p2 = scmp.lt.s32.totalorder %s2984_s19, %s2979_s29 }
  0x50   : > { %p2982_p5 = pnand %p3538_p4, %p2980_p3  ;;  %p2987_p6 = por %p2986_p2, %p2985_p11 }
  0x52   : > { %p2983_p12 = pneg %p2982_p5 }
  0x54   : > { %p2988_p0 = pnand %p2987_p6, %p2983_p12 }
  0x56   : > { %2991 = shalt.err (!%p2988_p0)
}
  0x57   : > { %s2992_s21 = scalar_lea.vmem %s3523_s16, 16  ;;  %s3319_s17 = smov [#allocation7]  }
  0x58   : > { %p2993_p10 = scmp.ne.s32.totalorder %s3523_s16, %s2992_s21  ;;  %s2997_s6 = sshll.u32 %s3319_s17, 4  ;;  %s2998_s6 = int_to_ptr.vmem [resolvable:$false] %s2997_s6 }
  0x59   : > { %s2999_s25 = scalar_lea.vmem %s2998_s6, 32  ;;  %p3000_p9 = scmp.lt.s32.totalorder %s3523_s16, %s2998_s6 }
  0x5a   : > { %p2995_p3 = pnand %p2993_p10, %p3538_p4  ;;  %p3001_p13 = scmp.lt.s32.totalorder %s2999_s25, %s2992_s21 }
  0x5c   : > { %p2996_p5 = pneg %p2995_p3  ;;  %p3002_p7 = por %p3001_p13, %p3000_p9 }
  0x5e   : > { %p3003_p8 = pnand %p3002_p7, %p2996_p5 }
  0x60   : > { %3006 = shalt.err (!%p3003_p8)
}
  0x61   : > { %2669 = dma.hbm_to_vmem [thread:$0]  (!%p3527_p1), %s3520_s7, 16, %s3523_s16, %s4160_s12  }
  0x62   : > { %s2366_s11 = sshll.u32 %s3514_s18, 6  ;;  %s2484_s29 = sshll.u32 %s3313_s24, 10 }
  0x63   : > { %s3567_s21 = scalar_lea.hbm %s4129_s3, %s2484_s29  ;;  %s468_s15 = scalar_lea.vmem [#allocation10], %s2366_s11 }
  0x64   : > { %s475_s6 = sshll.u32 %s468_s15, 4  ;;  %s4163_s25 = scalar_lea.sflag [#allocation11], %s3501_s26  ;;  %s3569_s6 = int_to_ptr.vmem [resolvable:$true] %s475_s6 }
  0x65   : > { %s3007_s1 = scalar_lea.hbm %s3567_s21, 1024  ;;  %s3012_s12 = scalar_lea.hbm %s4129_s3, 2048 }
  0x66   : > { %p3008_p7 = scmp.ne.s32.totalorder %s3567_s21, %s3007_s1  ;;  %p3013_p0 = scmp.lt.s32.totalorder %s3567_s21, %s4129_s3 }
  0x67   : > { %p3014_p9 = scmp.lt.s32.totalorder %s3012_s12, %s3007_s1 }
  0x68   : > { %p3010_p8 = pnand %p3008_p7, %p3538_p4 }
  0x69   : > { %p3015_p10 = por %p3014_p9, %p3013_p0 }
  0x6a   : > { %p3011_p13 = pneg %p3010_p8 }
  0x6c   : > { %p3016_p12 = pnand %p3015_p10, %p3011_p13 }
  0x6e   : > { %3019 = shalt.err (!%p3016_p12)
}
  0x6f   : > { %s3020_s11 = scalar_lea.vmem %s3569_s6, 1024  ;;  %s3320_s19 = smov [#allocation10]  }
  0x70   : > { %p3021_p11 = scmp.ne.s32.totalorder %s3569_s6, %s3020_s11  ;;  %s3025_s15 = sshll.u32 %s3320_s19, 4  ;;  %s3026_s15 = int_to_ptr.vmem [resolvable:$false] %s3025_s15 }
  0x71   : > { %s3027_s7 = scalar_lea.vmem %s3026_s15, 2048  ;;  %p3028_p3 = scmp.lt.s32.totalorder %s3569_s6, %s3026_s15 }
  0x72   : > { %p3023_p2 = pnand %p3021_p11, %p3538_p4  ;;  %p3029_p5 = scmp.lt.s32.totalorder %s3027_s7, %s3020_s11 }
  0x74   : > { %p3024_p6 = pneg %p3023_p2  ;;  %p3030_p7 = por %p3029_p5, %p3028_p3 }
  0x76   : > { %p3031_p8 = pnand %p3030_p7, %p3024_p6 }
  0x78   : > { %3034 = shalt.err (!%p3031_p8)
}
  0x79   : > { %s4161_s1 = smov 64   ;;  %s4162_s12 = smov 4  }
  0x7a   : > { %2675 = dma.hbm_to_vmem [thread:$0]  (!%p3527_p1), %s3567_s21, 1024, %s3569_s6, %s4163_s25, %s4161_s1, %s4161_s1, %s4162_s12  }
  0x7b   : > { %s3323_s16 = smov [#allocation4]   ;;  %s3324_s29 = smov [#allocation18]  }
  0x7c   : > { %s359_s17 = sshll.u32 %s3323_s16, 4  ;;  %s396_s11 = sshll.u32 %s3324_s29, 4  ;;  %s360_s17 = int_to_ptr.vmem [resolvable:$true] %s359_s17  ;;  %s397_s11 = int_to_ptr.vmem [resolvable:$true] %s396_s11 }
  0x7d   : > { %s3046_s19 = scalar_lea.vmem %s360_s17, 128  ;;  %p4189_p0 = scmp.ne.s32.totalorder %s4174_s14, 0 }
  0x7e   : > { %p3047_p13 = scmp.ne.s32.totalorder %s360_s17, %s3046_s19  ;;  %p3054_p12 = scmp.lt.s32.totalorder %s360_s17, %s360_s17 }
  0x7f   : > { %p3055_p11 = scmp.lt.s32.totalorder %s3046_s19, %s3046_s19 }
  0x80   : > { %p3049_p9 = pnand %p3047_p13, %p4189_p0 }
  0x81   : > { %p3056_p2 = por %p3055_p11, %p3054_p12 }
  0x82   : > { %p3050_p10 = pneg %p3049_p9 }
  0x84   : > { %p3057_p6 = pnand %p3056_p2, %p3050_p10 }
  0x86   : > { %3060 = shalt.err (!%p3057_p6)
}
  0x87   : > { %p4190_p3 = scmp.ne.s32.totalorder %s4173_s13, 0  ;;  %s3072_s15 = scalar_lea.vmem %s397_s11, 256 }
  0x88   : > { %p3073_p5 = scmp.ne.s32.totalorder %s397_s11, %s3072_s15  ;;  %p3080_p13 = scmp.lt.s32.totalorder %s397_s11, %s397_s11 }
  0x89   : > { %2653 = dma.hbm_to_vmem [thread:$0]  (!%p4190_p3), %s4126_s0, 128, %s360_s17, [#allocation5], %s4161_s1, %s4161_s1, %s4162_s12  }
  0x8a   : > { %p3075_p7 = pnand %p3073_p5, %p4189_p0  ;;  %p3081_p9 = scmp.lt.s32.totalorder %s3072_s15, %s3072_s15 }
  0x8c   : > { %p3076_p8 = pneg %p3075_p7  ;;  %p3082_p10 = por %p3081_p9, %p3080_p13 }
  0x8e   : > { %p3083_p12 = pnand %p3082_p10, %p3076_p8 }
  0x90   : > { %3086 = shalt.err (!%p3083_p12)
}
  0x91   : > { %s4191_s7 = smov 8   ;;  %s4192_s16 = smov 128  }
  0x92   : > { %2662 = dma.hbm_to_vmem [thread:$0]  (!%p4190_p3), %s4134_s8, 256, %s397_s11, [#allocation17], %s4192_s16, %s4192_s16, %s4191_s7  }
  0x93   : > { %s3325_s17 = smov [#allocation19]   ;;  %s4164_s6 = sshll.u32 %s3313_s24, 11 }
  0x94   : > { %s412_s21 = sshll.u32 %s3325_s17, 4  ;;  %s413_s21 = int_to_ptr.vmem [resolvable:$true] %s412_s21 }
  0x95   : > { %s3098_s1 = scalar_lea.vmem %s413_s21, 256  ;;  %p3106_p5 = scmp.lt.s32.totalorder %s413_s21, %s413_s21 }
  0x96   : > { %p3099_p11 = scmp.ne.s32.totalorder %s413_s21, %s3098_s1  ;;  %p3107_p7 = scmp.lt.s32.totalorder %s3098_s1, %s3098_s1 }
  0x98   : > { %p3101_p2 = pnand %p3099_p11, %p4189_p0  ;;  %p3108_p8 = por %p3107_p7, %p3106_p5 }
  0x9a   : > { %p3102_p6 = pneg %p3101_p2 }
  0x9c   : > { %p3109_p13 = pnand %p3108_p8, %p3102_p6 }
  0x9e   : > { %3112 = shalt.err (!%p3109_p13)
}
  0x9f   : > { %2665 = dma.hbm_to_vmem [thread:$0]  (!%p4190_p3), %s4136_s10, 256, %s413_s21, [#allocation20], %s4192_s16, %s4192_s16, %s4191_s7  }
  0xa0   : > { %s3633_s1 = scalar_lea.hbm %s4128_s2, %s4164_s6  ;;  %s4193_s19 = sshll.u32 %s3514_s18, 7 }
  0xa1   : > { %s447_s13 = scalar_lea.vmem [#allocation9], %s4193_s19  ;;  %s3113_s12 = scalar_lea.hbm %s3633_s1, 2048 }
  0xa2   : > { %s454_s17 = sshll.u32 %s447_s13, 4  ;;  %p3114_p0 = scmp.ne.s32.totalorder %s3633_s1, %s3113_s12  ;;  %s455_s17 = int_to_ptr.vmem [resolvable:$true] %s454_s17 }
  0xa3   : > { %s3118_s15 = scalar_lea.hbm %s4128_s2, 4096  ;;  %p3119_p3 = scmp.lt.s32.totalorder %s3633_s1, %s4128_s2 }
  0xa4   : > { %p3116_p9 = pnand %p3114_p0, %p3538_p4  ;;  %p3120_p12 = scmp.lt.s32.totalorder %s3118_s15, %s3113_s12 }
  0xa6   : > { %p3117_p10 = pneg %p3116_p9  ;;  %p3121_p11 = por %p3120_p12, %p3119_p3 }
  0xa8   : > { %p3122_p2 = pnand %p3121_p11, %p3117_p10 }
  0xaa   : > { %3125 = shalt.err (!%p3122_p2)
}
  0xab   : > { %s3126_s29 = scalar_lea.vmem %s455_s17, 2048  ;;  %s3326_s19 = smov [#allocation9]  }
  0xac   : > { %p3127_p6 = scmp.ne.s32.totalorder %s455_s17, %s3126_s29  ;;  %s3131_s13 = sshll.u32 %s3326_s19, 4  ;;  %s3132_s13 = int_to_ptr.vmem [resolvable:$false] %s3131_s13 }
  0xad   : > { %s3133_s6 = scalar_lea.vmem %s3132_s13, 4096  ;;  %p3134_p8 = scmp.lt.s32.totalorder %s455_s17, %s3132_s13 }
  0xae   : > { %p3129_p5 = pnand %p3127_p6, %p3538_p4  ;;  %p3135_p13 = scmp.lt.s32.totalorder %s3133_s6, %s3126_s29 }
  0xb0   : > { %p3130_p7 = pneg %p3129_p5  ;;  %p3136_p0 = por %p3135_p13, %p3134_p8 }
  0xb2   : > { %p3137_p9 = pnand %p3136_p0, %p3130_p7 }
  0xb4   : > { %3140 = shalt.err (!%p3137_p9)
}
  0xb5   : > { %s4194_s25 = scalar_lea.sflag [#allocation8], %s3501_s26  ;;  %s2485_s12 = sshll.u32 %s3313_s24, 12 }
  0xb6   : > { %2672 = dma.hbm_to_vmem [thread:$0]  (!%p3527_p1), %s3633_s1, 2048, %s455_s17, %s4194_s25, %s4192_s16, %s4192_s16, %s4191_s7  }
  0xb7   : > { %s4195_s11 = sshll.u32 %s3514_s18, 8  ;;  %s3664_s29 = scalar_lea.hbm %s4130_s4, %s2485_s12 }
  0xb8   : > { %s489_s21 = scalar_lea.vmem [#allocation12], %s4195_s11  ;;  %s3141_s19 = scalar_lea.hbm %s3664_s29, 4096 }
  0xb9   : > { %s496_s15 = sshll.u32 %s489_s21, 4  ;;  %p3142_p10 = scmp.ne.s32.totalorder %s3664_s29, %s3141_s19  ;;  %s3666_s15 = int_to_ptr.vmem [resolvable:$true] %s496_s15 }
  0xba   : > { %s3146_s1 = scalar_lea.hbm %s4130_s4, 8192  ;;  %p3147_p11 = scmp.lt.s32.totalorder %s3664_s29, %s4130_s4 }
  0xbb   : > { %p3144_p3 = pnand %p3142_p10, %p3538_p4  ;;  %p3148_p2 = scmp.lt.s32.totalorder %s3146_s1, %s3141_s19 }
  0xbd   : > { %p3145_p12 = pneg %p3144_p3  ;;  %p3149_p6 = por %p3148_p2, %p3147_p11 }
  0xbf   : > { %p3150_p5 = pnand %p3149_p6, %p3145_p12 }
  0xc1   : > { %3153 = shalt.err (!%p3150_p5)
}
  0xc2   : > { %s3154_s25 = scalar_lea.vmem %s3666_s15, 4096  ;;  %s3327_s12 = smov [#allocation12]  }
  0xc3   : > { %p3155_p7 = scmp.ne.s32.totalorder %s3666_s15, %s3154_s25  ;;  %s3159_s11 = sshll.u32 %s3327_s12, 4  ;;  %s3160_s11 = int_to_ptr.vmem [resolvable:$false] %s3159_s11 }
  0xc4   : > { %s3161_s21 = scalar_lea.vmem %s3160_s11, 8192  ;;  %p3162_p0 = scmp.lt.s32.totalorder %s3666_s15, %s3160_s11 }
  0xc5   : > { %p3157_p8 = pnand %p3155_p7, %p3538_p4  ;;  %p3163_p9 = scmp.lt.s32.totalorder %s3161_s21, %s3154_s25 }
  0xc7   : > { %p3158_p13 = pneg %p3157_p8  ;;  %p3164_p10 = por %p3163_p9, %p3162_p0 }
  0xc9   : > { %p3165_p3 = pnand %p3164_p10, %p3158_p13 }
  0xcb   : > { %3168 = shalt.err (!%p3165_p3)
}
  0xcc   : > { %s3328_s6 = smov 256   ;;  %s3329_s14 = smov 16  }
  0xcd   : > { %s4196_s19 = scalar_lea.sflag [#allocation11], %s3501_s26  ;;  %s4197_s7 = sshll.u32 %s3313_s24, 11 }
  0xce   : > { %2678 = dma.hbm_to_vmem [thread:$0]  (!%p3527_p1), %s3664_s29, 4096, %s3666_s15, %s4196_s19, %s3328_s6, %s3328_s6, %s3329_s14  }
  0xcf   : > { %s3695_s17 = scalar_lea.hbm %s4131_s5, %s4197_s7  ;;  %s4198_s13 = sshll.u32 %s3514_s18, 7 }
  0xd0   : > { %s510_s25 = scalar_lea.vmem [#allocation13], %s4198_s13  ;;  %s507_s11 = scalar_lea.sflag [#allocation14], %s3501_s26 }
  0xd1   : > { %s517_s12 = sshll.u32 %s510_s25, 4  ;;  %s3169_s21 = scalar_lea.hbm %s3695_s17, 2048  ;;  %s3699_s12 = int_to_ptr.vmem [resolvable:$true] %s517_s12 }
  0xd2   : > { %p3170_p12 = scmp.ne.s32.totalorder %s3695_s17, %s3169_s21  ;;  %s3174_s6 = scalar_lea.hbm %s4131_s5, 4096 }
  0xd3   : > { %p3175_p6 = scmp.lt.s32.totalorder %s3695_s17, %s4131_s5  ;;  %p3176_p5 = scmp.lt.s32.totalorder %s3174_s6, %s3169_s21 }
  0xd4   : > { %p3172_p11 = pnand %p3170_p12, %p3538_p4 }
  0xd5   : > { %p3177_p7 = por %p3176_p5, %p3175_p6 }
  0xd6   : > { %p3173_p2 = pneg %p3172_p11 }
  0xd8   : > { %p3178_p8 = pnand %p3177_p7, %p3173_p2 }
  0xda   : > { %3181 = shalt.err (!%p3178_p8)
}
  0xdb   : > { %s3182_s26 = scalar_lea.vmem %s3699_s12, 2048  ;;  %s3330_s18 = smov [#allocation13]  }
  0xdc   : > { %p3183_p13 = scmp.ne.s32.totalorder %s3699_s12, %s3182_s26  ;;  %s3187_s7 = sshll.u32 %s3330_s18, 4  ;;  %s3188_s7 = int_to_ptr.vmem [resolvable:$false] %s3187_s7 }
  0xdd   : > { %s3189_s16 = scalar_lea.vmem %s3188_s7, 4096  ;;  %p3190_p10 = scmp.lt.s32.totalorder %s3699_s12, %s3188_s7 }
  0xde   : > { %p3185_p0 = pnand %p3183_p13, %p3538_p4  ;;  %p3191_p3 = scmp.lt.s32.totalorder %s3189_s16, %s3182_s26 }
  0xe0   : > { %p3186_p9 = pneg %p3185_p0  ;;  %p3192_p12 = por %p3191_p3, %p3190_p10 }
  0xe2   : > { %p3193_p11 = pnand %p3192_p12, %p3186_p9 }
  0xe4   : > { %3196 = shalt.err (!%p3193_p11)
}
  0xe5   : > { %s4199_s1 = smov 4   ;;  %s4200_s13 = smov 64  }
  0xe6   : > { %2681 = dma.hbm_to_vmem [thread:$0]  (!%p3527_p1), %s3695_s17, 2048, %s3699_s12, %s507_s11, %s4200_s13, %s4200_s13, %s4199_s1  }
  0xe7   : > { %p4201_p4 = scmp.ne.s32.totalorder %s4172_s28, 0 }
  0xe8   : > { %p4202_p2 = scmp.eq.s32.totalorder (!%p4201_p4), %s3431_s27, 0 }
  0xe9   : > { %529 = sbr.rel (%p4201_p4) target bundleno = 2881 (0xb41), region = 64 }
  0xee   : > { %3264 = dma.done.wait (%p4202_p2), [#allocation5], 128   ;;  %p4203_p6 = pmov %p4202_p2 }
  0xef   : > { %s535_s20 = sand.u32 1, %s3431_s27   ;;  %s3733_s23 = sand.u32 1, %s3305_s22  }
  0xf0   : > { %3266 = vsyncadd (%p4203_p6), [#allocation5], 4294967168  ;;  %s536_s25 = scalar_lea.sflag [#allocation8], %s535_s20  ;;  %s538_s21 = scalar_lea.vmem [#allocation7], %s3733_s23 }
  0xf1   : > { %p4204_p5 = scmp.ne.s32.totalorder %s4181_s30, 0 }
  0xf3   : > { %3268 = dma.done.wait (%p4204_p5), %s536_s25, 2064  }
  0xf4   : > { %3270 = vsyncadd (%p4204_p5), %s536_s25, 4294965232  ;;  %s2377_s28 = sshll.u32 %s3733_s23, 7  ;;  %s2378_s17 = sshll.u32 %s3733_s23, 6 }
  0xf5   : > { %s3742_s12 = scalar_lea.vmem [#allocation9], %s2377_s28  ;;  %s553_s11 = scalar_lea.sflag [#allocation11], %s535_s20 }
  0xf6   : > { %s3744_s15 = scalar_lea.vmem [#allocation10], %s2378_s17 }
  0xf7   : > { %3272 = dma.done.wait (%p4204_p5), %s553_s11, 5120  }
  0xf8   : > { %3274 = vsyncadd (%p4204_p5), %s553_s11, 4294962176  ;;  %s2379_s29 = sshll.u32 %s3733_s23, 8  ;;  %s571_s14 = scalar_lea.sflag [#allocation14], %s535_s20 }
  0xf9   : > { %s3751_s6 = scalar_lea.vmem [#allocation12], %s2379_s29  ;;  %s3753_s19 = scalar_lea.vmem [#allocation13], %s2377_s28 }
  0xfa   : > { %3276 = dma.done.wait (%p4204_p5), %s571_s14, 2048  }
  0xfb   : > { %3278 = vsyncadd (%p4204_p5), %s571_s14, 4294965248  ;;  %p4205_p1 = pmov %p4202_p2 }
  0xfd   : > { %3280 = dma.done.wait (%p4205_p1), [#allocation14], 16   ;;  %p4206_p7 = pmov %p4205_p1 }
  0xfe   : > { %p4207_p8 = pmov %p4205_p1 }
  0xff   : > { %3282 = vsyncadd (%p4206_p7), [#allocation14], 4294967280 }
 0x100   : > { %3284 = dma.done.wait (%p4207_p8), [#allocation17], 512   ;;  %p4208_p13 = pmov %p4205_p1 }
 0x101   : > { %p4209_p0 = pmov %p4205_p1 }
 0x102   : > { %3286 = vsyncadd (%p4208_p13), [#allocation17], 4294966784 }
 0x103   : > { %3288 = dma.done.wait (%p4209_p0), [#allocation20], 256   ;;  %p4210_p9 = pmov %p4209_p0 }
 0x104   : > { %s2385_s30 = sshll.u32 %s3733_s23, 3  ;;  %p4211_p10 = scmp.ne.s32.totalorder %s3431_s27, 0 }
 0x105   : > { %3290 = vsyncadd (%p4210_p9), [#allocation20], 4294967040  ;;  %s3772_s26 = scalar_lea.vmem [#allocation22], %s2385_s30 }
 0x106   : > { %654 = sbr.rel (%p4211_p10) target bundleno = 271 (0x10f), region = 108 }
 0x10b   : > { %v2491_v0 = vld [vmem:[#allocation4] sm:$0xff]   ;;  %v3331_v3 = vmov 0.0  }
 0x10c   : > { %v2492_v1 = vunpack.c.l.bf16 %v2491_v0  ;;  %v2493_v2 = vunpack.c.h.bf16 %v2491_v0  ;;  %661 = vst [vmem:[#allocation3 + $0x8] sm:$0xff] %v3331_v3  ;;  %662 = vst [vmem:[#allocation3] sm:$0xff] %v3331_v3 }
 0x10e   : > { %659 = vst [vmem:[#allocation2] sm:$0xff] %v2492_v1  ;;  %660 = vst [vmem:[#allocation2 + $0x8] sm:$0xff] %v2493_v2 }
 0x10f PF: > { %v2771_v10 = vld [vmem:[%s3742_s12 + $0x74] ss:$8 sps:$4 sm:$0xff]   ;;  %v2773_v11 = vld [vmem:[%s3742_s12 + $0x70] ss:$8 sps:$4 sm:$0xff]   ;;  %v2774_v14 = vld [vmem:[%s3742_s12 + $0x64] ss:$8 sps:$4 sm:$0xff]   ;;  %v686_v35 = vlaneseq }
 0x110   : > { %789 = vmatprep.subr.bf16.mxu0 %v2771_v10  ;;  %v2776_v15 = vld [vmem:[%s3742_s12 + $0x60] ss:$8 sps:$4 sm:$0xff]   ;;  %v2777_v16 = vld [vmem:[%s3742_s12 + $0x54] ss:$8 sps:$4 sm:$0xff]   ;;  %v2779_v17 = vld [vmem:[%s3742_s12 + $0x50] ss:$8 sps:$4 sm:$0xff]  }
 0x111   : > { %790 = vmatpush1.bf16.msra.mxu0 %v2773_v11  ;;  %v2780_v18 = vld [vmem:[%s3742_s12 + $0x44] ss:$8 sps:$4 sm:$0xff]   ;;  %v2782_v19 = vld [vmem:[%s3742_s12 + $0x40] ss:$8 sps:$4 sm:$0xff]   ;;  %v2783_v20 = vld [vmem:[%s3742_s12 + $0x34] ss:$8 sps:$4 sm:$0xff]  }
 0x112   : > { %791 = vmatprep.subr.bf16.mxu0 %v2774_v14  ;;  %v2785_v21 = vld [vmem:[%s3742_s12 + $0x30] ss:$8 sps:$4 sm:$0xff]   ;;  %v2786_v22 = vld [vmem:[%s3742_s12 + $0x24] ss:$8 sps:$4 sm:$0xff]   ;;  %v2788_v23 = vld [vmem:[%s3742_s12 + $0x20] ss:$8 sps:$4 sm:$0xff]  }
 0x113   : > { %v665_v5 = vld [vmem:[#allocation3 + $0x8] sm:$0xff]  ;;  %v666_v8 = vld [vmem:[#allocation3] sm:$0xff]  ;;  %v3332_v24 = vmov 0   ;;  %v3801_v36 = vshrl.u32 %v686_v35, 7  ;;  %s3333_s18 = smov 48   ;;  %s3334_s7 = smov 112  }
 0x114   : > { %821 = vmatprep.mubr.bf16.mxu0 %v3332_v24  ;;  %v2789_v25 = vld [vmem:[%s3742_s12 + $0x14] ss:$8 sps:$4 sm:$0xff]   ;;  %v2791_v26 = vld [vmem:[%s3742_s12 + $0x10] ss:$8 sps:$4 sm:$0xff]   ;;  %v2792_v27 = vld [vmem:[%s3742_s12 + $0x4] ss:$8 sps:$4 sm:$0xff]  }
 0x115   : > { %v663_v4 = vld [vmem:[#allocation2] sm:$0xff]  ;;  %v664_v6 = vld [vmem:[#allocation2 + $0x8] sm:$0xff]  ;;  %792 = vmatpush1.bf16.msra.mxu0 %v2776_v15  ;;  %v669_v37 = vld [vmem:[%s538_s21] sm:$0x1]  ;;  %v688_v39 = vsub.s32 0, %v3801_v36  ;;  %s3335_s16 = smov 80  }
 0x116   : > { %v3776_v7 = vadd.f32 %v665_v5, %v663_v4  ;;  %v3778_v9 = vadd.f32 %v666_v8, %v664_v6  ;;  %793 = vmatprep.subr.bf16.mxu0 %v2777_v16  ;;  %v2794_v28 = vld [vmem:[%s3742_s12] ss:$8 sps:$4 sm:$0xff]   ;;  %v685_v38 = vunpack.c.l.bf16 %v669_v37  ;;  %s3336_s1 = smov 16   ;;  %v3337_v52 = vmov 0.0   ;;  %s3339_s17 = smov 96  }
 0x117   : > { %2546 = vmatprep.subr.bf16.mxu1 %v3337_v52  ;;  %vm3338_vm0 = vmmov 0   ;;  %v3830_v56 = vand.u32 127, %v686_v35  ;;  %vm894_vm1 = vcmask 392192   ;;  %vm867_vm2 = vcmask 130048   ;;  %v878_v4 = vld [vmem:[#allocation19] sm:$0xff]  ;;  %v879_v8 = vld [vmem:[#allocation19 + $0x8] sm:$0xff] }
 0x118   : > { %v670_v12 = vmul.f32 %v3776_v7, %v3776_v7  ;;  %v671_v13 = vmul.f32 %v3778_v9, %v3778_v9  ;;  %v689_v42 = vrot.slane %v685_v38, %v688_v39  ;;  %2548 = vmatprep.mubr.msk.bf16.mxu1 %vm3338_vm0, %v3337_v52  ;;  %v876_v11 = vld [vmem:[%s4135_s9] sm:$0xff]  ;;  %vm942_vm4 = vcmask 261120   ;;  %s3340_s12 = smov 32   ;;  %s3341_s11 = smov 64  }
 0x119   : > { %794 = vmatpush1.bf16.msra.mxu0 %v2779_v17  ;;  %v842_v59 = vand.u32 31, %v3830_v56  ;;  %vm924_vm5 = vcmask 523264   ;;  %vm940_vm6 = vcmp.le.s32.totalorder %v3830_v56, %v3801_v36  ;;  %vm1453_vm8 = vcmask 785408   ;;  %p2473_p3 = scmp.ne.s32.totalorder %s3431_s27, 1 }
 0x11a   : > { %672 = vadd.xlane.f32.xlu0 %v670_v12  ;;  %795 = vmatprep.subr.bf16.mxu0 %v2780_v18  ;;  %v877_v12 = vld [vmem:[%s4135_s9 + $0x8] sm:$0xff] }
 0x11b   : > { %vm3833_vm3 = vcmp.lt.s32.totalorder %v842_v59, 16 }
 0x11d   : > { %796 = vmatpush1.bf16.msra.mxu0 %v2782_v19 }
 0x11e   : > { %674 = vadd.xlane.f32.xlu0 %v671_v13  ;;  %797 = vmatprep.subr.bf16.mxu0 %v2783_v20 }
 0x121   : > { %798 = vmatpush1.bf16.msra.mxu0 %v2785_v21 }
 0x122   : > { %799 = vmatprep.subr.bf16.mxu0 %v2786_v22  ;;  %v835_v22 = vld [vmem:[#allocation18 + $0x8] sm:$0xff] }
 0x125   : > { %800 = vmatpush1.bf16.msra.mxu0 %v2788_v23 }
 0x126   : > { %801 = vmatprep.subr.bf16.mxu0 %v2789_v25 }
 0x129   : > { %802 = vmatpush1.bf16.msra.mxu0 %v2791_v26 }
 0x12a   : > { %803 = vmatprep.subr.bf16.mxu0 %v2792_v27  ;;  %v832_v27 = vld [vmem:[#allocation16] sm:$0xff] }
 0x12d   : > { %804 = vmatpush1.bf16.msra.mxu0 %v2794_v28  ;;  %v833_v28 = vld [vmem:[#allocation16 + $0x8] sm:$0xff] }
 0x12e   : > { %2570 = vmatprep.subr.bf16.mxu0 %v3337_v52 }
 0x1a3   : > { %v673_v29 = vpop.xlane.xlu0 %672 }
 0x1a4   : > { %v677_v30 = vmul.f32 0.0078125, %v673_v29 }
 0x1a6   : > { %v679_v31 = vadd.f32 1e-05, %v677_v30  ;;  %v834_v30 = vld [vmem:[#allocation18] sm:$0xff] }
 0x1a7   : > { %v675_v32 = vpop.xlane.xlu0 %674 }
 0x1a8   : > { %2867 = vrsqrt.f32 %v679_v31  ;;  %v678_v33 = vmul.f32 0.0078125, %v675_v32 }
 0x1aa   : > { %v680_v34 = vadd.f32 1e-05, %v678_v33 }
 0x1ac   : > { %2869 = vrsqrt.f32 %v680_v34 }
 0x1b5   : > { %v2868_v40 = vpop.eup %2867 }
 0x1b6   : > { %v683_v41 = vmul.f32 %v2868_v40, %v3776_v7 }
 0x1b8   : > { %v690_v45 = vmul.f32 %v689_v42, %v683_v41 }
 0x1b9   : > { %v2870_v43 = vpop.eup %2869 }
 0x1ba   : > { %v684_v44 = vmul.f32 %v2870_v43, %v3778_v9 }
 0x1bc   : > { %v691_v46 = vmul.f32 %v689_v42, %v684_v44 }
 0x1be   : > { %v692_v47 = vpack.c.bf16 %v691_v46, %v690_v45 }
 0x1c0   : > { %822 = vmatmul.mubr.bf16.vlgmr.msra.gmra.mxu0 %v692_v47 }
 0x1c1   : > { %2572 = vmatprep.mubr.msk.bf16.mxu0 %vm3338_vm0, %v3337_v52 }
 0x280   : > { %v3810_v48 = vpop.f32.mrf.mxu0 }
 0x281   : > { %v870_v35 = vmul.f32 %v832_v27, %v3810_v48 }
 0x282   : > { %v3812_v49 = vpop.f32.mrf.mxu0 }
 0x283   : > { %888 = vrot.lane.b32.xlu0 %v3812_v49, %s3333_s18  ;;  %882 = vrot.lane.b32.xlu1 %v3812_v49, %s3334_s7  ;;  %v915_v19 = vmul.f32 %v876_v11, %v3812_v49 }
 0x284   : > { %v3816_v50 = vpop.f32.mrf.mxu0 }
 0x285   : > { %v871_v41 = vmul.f32 %v833_v28, %v3816_v50 }
 0x286   : > { %v829_v51 = vpop.f32.mrf.mxu0 }
 0x287   : > { %899 = vrot.lane.b32.xlu1 %v3812_v49, %s3335_s16  ;;  %855 = vrot.lane.b32.xlu0 %v3816_v50, %s3334_s7  ;;  %v916_v20 = vmul.f32 %v877_v12, %v829_v51  ;;  %v3853_v32 = vpack.c.bf16 %v829_v51, %v3812_v49 }
 0x28b   : > { %905 = vrot.lane.b32.xlu1 %v3812_v49, %s3336_s1  ;;  %863 = vrot.lane.b32.xlu0 %v3816_v50, %s3336_s1  ;;  %v3874_v49 = vadd.s32 8, %v3801_v36 }
 0x28d   : > { %vm941_vm7 = vcmp.le.s32.totalorder %v3830_v56, %v3874_v49 }
 0x28f   : > { %884 = vrot.lane.b32.xlu1 %v829_v51, %s3334_s7 }
 0x293   : > { %890 = vrot.lane.b32.xlu1 %v829_v51, %s3333_s18 }
 0x297   : > { %901 = vrot.lane.b32.xlu1 %v829_v51, %s3335_s16 }
 0x29b   : > { %907 = vrot.lane.b32.xlu1 %v829_v51, %s3336_s1 }
 0x29f   : > { %853 = vrot.lane.b32.xlu1 %v3810_v48, %s3334_s7 }
 0x2a3   : > { %861 = vrot.lane.b32.xlu1 %v3810_v48, %s3336_s1 }
 0x2f5   : > { %v883_v53 = vpop.permute.xlu1 %882  ;;  %v889_v58 = vpop.permute.xlu0 %888 }
 0x2f6   : > { %v895_v61 = vsel %vm894_vm1, %v883_v53, %v889_v58 }
 0x2f7   : > { %v897_v0 = vsub.f32 0.0, %v895_v61 }
 0x2f9   : > { %v900_v54 = vpop.permute.xlu1 %899  ;;  %v856_v1 = vpop.permute.xlu0 %855 }
 0x2fa   : > { %v860_v17 = vsub.f32 0.0, %v856_v1 }
 0x2fd   : > { %v906_v55 = vpop.permute.xlu1 %905  ;;  %v864_v15 = vpop.permute.xlu0 %863 }
 0x2fe   : > { %v911_v63 = vsel %vm867_vm2, %v900_v54, %v906_v55  ;;  %v869_v23 = vsel %vm3833_vm3, %v860_v17, %v864_v15 }
 0x2ff   : > { %v913_v5 = vsel %vm3833_vm3, %v897_v0, %v911_v63  ;;  %v873_v33 = vmul.f32 %v869_v23, %v835_v22 }
 0x300   : > { %v917_v13 = vmul.f32 %v913_v5, %v878_v4 }
 0x301   : > { %v885_v57 = vpop.permute.xlu1 %884  ;;  %v875_v45 = vadd.f32 %v873_v33, %v871_v41 }
 0x302   : > { %v919_v25 = vadd.f32 %v917_v13, %v915_v19 }
 0x305   : > { %v891_v60 = vpop.permute.xlu1 %890 }
 0x306   : > { %v896_v3 = vsel %vm894_vm1, %v885_v57, %v891_v60 }
 0x307   : > { %v898_v6 = vsub.f32 0.0, %v896_v3 }
 0x309   : > { %v902_v2 = vpop.permute.xlu1 %901 }
 0x30d   : > { %v908_v10 = vpop.permute.xlu1 %907 }
 0x30e   : > { %v912_v14 = vsel %vm867_vm2, %v902_v2, %v908_v10 }
 0x30f   : > { %v914_v16 = vsel %vm3833_vm3, %v898_v6, %v912_v14 }
 0x310   : > { %v918_v18 = vmul.f32 %v914_v16, %v879_v8 }
 0x311   : > { %v854_v21 = vpop.permute.xlu1 %853 }
 0x312   : > { %v920_v26 = vadd.f32 %v918_v18, %v916_v20  ;;  %v859_v29 = vsub.f32 0.0, %v854_v21 }
 0x314   : > { %v922_v31 = vpack.c.bf16 %v920_v26, %v919_v25 }
 0x315   : > { %v862_v34 = vpop.permute.xlu1 %861 }
 0x316   : > { %v868_v37 = vsel %vm3833_vm3, %v859_v29, %v862_v34  ;;  %v3859_v38 = vsel %vm942_vm4, %v922_v31, 0  ;;  %v927_v40 = vsel %vm924_vm5, %v922_v31, %v3853_v32 }
 0x317   : > { %v872_v42 = vmul.f32 %v868_v37, %v834_v30  ;;  %2547 = vmatpush3.bf16.xpose.msra.mxu1 %v3859_v38  ;;  %v2403_v43 = vcombine.low %v927_v40, %v927_v40  ;;  %v2404_v44 = vcombine.high %v927_v40, %v927_v40 }
 0x318   : > { %2552 = vmatprep.subr.bf16.mxu1 %v3337_v52 }
 0x319   : > { %v874_v46 = vadd.f32 %v872_v42, %v870_v35  ;;  %935 = vst [vmem:[%s3772_s26] sm:$0xf] %v2403_v43  ;;  %936 = vst [vmem:[%s3772_s26 + $0x4] sm:$0xf] %v2404_v44 }
 0x31b   : > { %v921_v47 = vpack.c.bf16 %v875_v45, %v874_v46 }
 0x31e   : > { %2549 = vmatmul.mubr.msk.bf16.vlgmr.msra.gmra.mxu1 %vm942_vm4, %v921_v47 }
 0x31f   : > { %2554 = vmatprep.mubr.msk.bf16.mxu1 %vm3338_vm0, %v3337_v52 }
 0x3de   : > { %v982_v48 = vpop.f32.mrf.mxu1 }
 0x3df   : > { %v989_v50 = vmul.f32 0.17677669, %v982_v48 }
 0x3e0   : > { %v2550_v51 = vpop.f32.mrf.mxu1 }
 0x3e1   : > { %v991_v53 = vsel %vm940_vm6, %v989_v50, -1e+30 }
 0x3e2   : > { %v985_v54 = vpop.f32.mrf.mxu1  ;;  %v993_v55 = vsel %vm867_vm2, %v991_v53, -inf }
 0x3e3   : > { %v990_v57 = vmul.f32 0.17677669, %v985_v54  ;;  %994 = vmax.xlane.f32.xlu1 %v993_v55 }
 0x3e4   : > { %v2551_v58 = vpop.f32.mrf.mxu1 }
 0x3e5   : > { %v992_v59 = vsel %vm941_vm7, %v990_v57, -1e+30 }
 0x3e6   : > { %v996_v60 = vsel %vm867_vm2, %v992_v59, -inf }
 0x3e7   : > { %997 = vmax.xlane.f32.xlu0 %v996_v60 }
 0x3f4   : > { %1065 = vrot.lane.b32.xlu1 %v921_v47, %s3339_s17 }
 0x3f8   : > { %1185 = vrot.lane.b32.xlu1 %v922_v31, %s3339_s17 }
 0x3fc   : > { %1308 = vrot.lane.b32.xlu1 %v921_v47, %s3340_s12 }
 0x3fd   : > { %1013 = vrot.lane.b32.xlu0 %v3853_v32, %s3341_s11 }
 0x401   : > { %1182 = vrot.lane.b32.xlu0 %v921_v47, %s3341_s11 }
 0x46c   : > { %v995_v61 = vpop.xlane.xlu1 %994 }
 0x46d   : > { %v999_v62 = vsub.f32 %v991_v53, %v995_v61 }
 0x46f   : > { %v1001_v63 = vmul.f32 1.442695, %v999_v62 }
 0x470   : > { %v1066_v0 = vpop.permute.xlu1 %1065  ;;  %v998_v1 = vpop.xlane.xlu0 %997 }
 0x471   : > { %v1000_v2 = vsub.f32 %v992_v59, %v998_v1  ;;  %2871 = vpow2.f32 %v1001_v63 }
 0x473   : > { %v1003_v3 = vmul.f32 1.442695, %v1000_v2 }
 0x474   : > { %v1186_v4 = vpop.permute.xlu1 %1185  ;;  %v1014_v5 = vpop.permute.xlu0 %1013 }
 0x475   : > { %2873 = vpow2.f32 %v1003_v3  ;;  %v1191_v6 = vsel %vm942_vm4, %v1186_v4, 0  ;;  %2553 = vmatpush3.bf16.msra.mxu1 %v1014_v5 }
 0x476   : > { %2571 = vmatpush3.bf16.xpose.msra.mxu0 %v1191_v6  ;;  %2558 = vmatprep.subr.bf16.mxu1 %v3337_v52 }
 0x477   : > { %2582 = vmatprep.subr.bf16.mxu0 %v3337_v52 }
 0x478   : > { %v1183_v8 = vpop.permute.xlu0 %1182  ;;  %v1309_v13 = vpop.permute.xlu1 %1308 }
 0x47d   : > { %2573 = vmatmul.mubr.msk.bf16.vlgmr.msra.gmra.mxu0 %vm942_vm4, %v1183_v8 }
 0x47e   : > { %2583 = vmatpush3.bf16.xpose.msra.mxu0 %v1191_v6  ;;  %2584 = vmatprep.mubr.msk.bf16.mxu0 %vm3338_vm0, %v3337_v52  ;;  %v3899_v10 = vpop.eup %2871 }
 0x47f   : > { %2594 = vmatprep.subr.bf16.mxu0 %v3337_v52 }
 0x482   : > { %v3901_v11 = vpop.eup %2873 }
 0x483   : > { %v1011_v12 = vpack.c.bf16 %v3901_v11, %v3899_v10 }
 0x485   : > { %2555 = vmatmul.mubr.msk.bf16.vlgmr.msra.gmra.mxu1 %vm867_vm2, %v1011_v12  ;;  %2585 = vmatmul.mubr.msk.bf16.vlgmr.msra.gmra.mxu0 %vm942_vm4, %v1309_v13 }
 0x486   : > { %2559 = vmatpush3.bf16.xpose.msra.mxu1 %v3859_v38  ;;  %2560 = vmatprep.mubr.msk.bf16.mxu1 %vm3338_vm0, %v3337_v52 }
 0x487   : > { %2564 = vmatprep.subr.bf16.mxu1 %v3337_v52  ;;  %2610 = vmatprep.mubr.msk.bf16.mxu0 %vm3338_vm0, %v3337_v52 }
 0x48d   : > { %2561 = vmatmul.mubr.msk.bf16.vlgmr.msra.gmra.mxu1 %vm942_vm4, %v1066_v0 }
 0x48e   : > { %2565 = vmatpush3.bf16.msra.mxu1 %v1014_v5  ;;  %2566 = vmatprep.mubr.msk.bf16.mxu1 %vm3338_vm0, %v3337_v52 }
 0x48f   : > { %2576 = vmatprep.subr.bf16.mxu1 %v3337_v52 }
 0x53d   : > { %v1227_v14 = vpop.f32.mrf.mxu0 }
 0x53e   : > { %v1234_v27 = vmul.f32 0.17677669, %v1227_v14 }
 0x53f   : > { %v2574_v15 = vpop.f32.mrf.mxu0 }
 0x540   : > { %v1236_v35 = vsel %vm940_vm6, %v1234_v27, -1e+30 }
 0x541   : > { %v1230_v16 = vpop.f32.mrf.mxu0  ;;  %v1238_v43 = vsel %vm867_vm2, %v1236_v35, -inf }
 0x542   : > { %v1235_v37 = vmul.f32 0.17677669, %v1230_v16 }
 0x543   : > { %v2575_v17 = vpop.f32.mrf.mxu0 }
 0x544   : > { %v1237_v46 = vsel %vm941_vm7, %v1235_v37, -1e+30 }
 0x545   : > { %v3917_v18 = vpop.f32.mrf.mxu1  ;;  %v1347_v19 = vpop.f32.mrf.mxu0  ;;  %v1241_v48 = vsel %vm867_vm2, %v1237_v46, -inf }
 0x546   : > { %v1354_v38 = vmul.f32 0.17677669, %v1347_v19 }
 0x547   : > { %v2556_v20 = vpop.f32.mrf.mxu1  ;;  %v2586_v21 = vpop.f32.mrf.mxu0 }
 0x548   : > { %v1356_v47 = vsel %vm940_vm6, %v1354_v38, -1e+30 }
 0x549   : > { %v3919_v22 = vpop.f32.mrf.mxu1  ;;  %v1350_v23 = vpop.f32.mrf.mxu0  ;;  %v1358_v50 = vsel %vm867_vm2, %v1356_v47, -inf }
 0x54a   : > { %v1355_v45 = vmul.f32 0.17677669, %v1350_v23 }
 0x54b   : > { %v2557_v25 = vpop.f32.mrf.mxu1  ;;  %v2587_v26 = vpop.f32.mrf.mxu0 }
 0x54c   : > { %v1357_v51 = vsel %vm941_vm7, %v1355_v45, -1e+30 }
 0x54d   : > { %v1104_v28 = vpop.f32.mrf.mxu1  ;;  %v1361_v53 = vsel %vm867_vm2, %v1357_v51, -inf }
 0x54e   : > { %v1111_v29 = vmul.f32 0.17677669, %v1104_v28 }
 0x54f   : > { %v2562_v30 = vpop.f32.mrf.mxu1 }
 0x550   : > { %v1113_v31 = vsel %vm940_vm6, %v1111_v29, -1e+30  ;;  %v1005_v29 = vsel %vm867_vm2, %v3899_v10, 0.0  ;;  %v1008_v30 = vsel %vm867_vm2, %v3901_v11, 0.0  ;;  %v2798_v11 = vld [vmem:[%s3744_s15 + $0x20] sm:$0xff]  }
 0x551   : > { %v1107_v33 = vpop.f32.mrf.mxu1  ;;  %v1115_v34 = vsel %vm867_vm2, %v1113_v31, -inf }
 0x552   : > { %v1112_v40 = vmul.f32 0.17677669, %v1107_v33  ;;  %1116 = vmax.xlane.f32.xlu0 %v1115_v34  ;;  %v2796_v33 = vld [vmem:[%s3744_s15 + $0x30] sm:$0xff]   ;;  %v2797_v34 = vld [vmem:[%s3744_s15 + $0x28] sm:$0xff]  }
 0x553   : > { %v2563_v41 = vpop.f32.mrf.mxu1 }
 0x554   : > { %v1114_v42 = vsel %vm941_vm7, %v1112_v40, -1e+30  ;;  %v2799_v40 = vld [vmem:[%s3744_s15 + $0x18] sm:$0xff]  }
 0x555   : > { %v1118_v44 = vsel %vm867_vm2, %v1114_v42, -inf }
 0x556   : > { %1239 = vmax.xlane.f32.xlu0 %v1238_v43  ;;  %1119 = vmax.xlane.f32.xlu1 %v1118_v44 }
 0x55a   : > { %1242 = vmax.xlane.f32.xlu0 %v1241_v48  ;;  %1359 = vmax.xlane.f32.xlu1 %v1358_v50 }
 0x55e   : > { %1362 = vmax.xlane.f32.xlu0 %v1361_v53 }
 0x56b   : > { %1257 = vrot.lane.b32.xlu1 %v3853_v32, %s3340_s12 }
 0x5db   : > { %v1117_v54 = vpop.xlane.xlu0 %1116 }
 0x5dc   : > { %v1121_v55 = vsub.f32 %v1113_v31, %v1117_v54  ;;  %v2795_v31 = vld [vmem:[%s3744_s15 + $0x38] sm:$0xff]  }
 0x5dd   : > { %2595 = vmatpush3.bf16.msra.mxu0 %v2795_v31 }
 0x5de   : > { %v1123_v57 = vmul.f32 1.442695, %v1121_v55  ;;  %2596 = vmatprep.subr.bf16.mxu0 %v3337_v52  ;;  %v2801_v55 = vld [vmem:[%s3744_s15 + $0x8] sm:$0xff]  }
 0x5df   : > { %v1240_v58 = vpop.xlane.xlu0 %1239  ;;  %v1120_v59 = vpop.xlane.xlu1 %1119 }
 0x5e0   : > { %v1244_v60 = vsub.f32 %v1236_v35, %v1240_v58  ;;  %v1122_v61 = vsub.f32 %v1114_v42, %v1120_v59  ;;  %2875 = vpow2.f32 %v1123_v57 }
 0x5e1   : > { %2597 = vmatpush3.bf16.msra.mxu0 %v2796_v33 }
 0x5e2   : > { %v1246_v62 = vmul.f32 1.442695, %v1244_v60  ;;  %v1125_v63 = vmul.f32 1.442695, %v1122_v61  ;;  %2598 = vmatprep.subr.bf16.mxu0 %v3337_v52 }
 0x5e3   : > { %v1243_v0 = vpop.xlane.xlu0 %1242  ;;  %v1360_v1 = vpop.xlane.xlu1 %1359 }
 0x5e4   : > { %2877 = vpow2.f32 %v1246_v62  ;;  %v1245_v56 = vsub.f32 %v1237_v46, %v1243_v0  ;;  %v1364_v32 = vsub.f32 %v1356_v47, %v1360_v1  ;;  %v2802_v0 = vld [vmem:[%s3744_s15] sm:$0xff]  }
 0x5e5   : > { %2879 = vpow2.f32 %v1125_v63  ;;  %2599 = vmatpush3.bf16.msra.mxu0 %v2797_v34 }
 0x5e6   : > { %v1248_v49 = vmul.f32 1.442695, %v1245_v56  ;;  %v1366_v5 = vmul.f32 1.442695, %v1364_v32  ;;  %2600 = vmatprep.subr.bf16.mxu0 %v3337_v52 }
 0x5e7   : > { %v1363_v2 = vpop.xlane.xlu0 %1362  ;;  %v1258_v16 = vpop.permute.xlu1 %1257 }
 0x5e8   : > { %2881 = vpow2.f32 %v1248_v49  ;;  %v1365_v3 = vsub.f32 %v1357_v51, %v1363_v2  ;;  %v2800_v51 = vld [vmem:[%s3744_s15 + $0x10] sm:$0xff]  }
 0x5e9   : > { %2601 = vmatpush3.bf16.msra.mxu0 %v2798_v11  ;;  %v2808_v11 = vld [vmem:[%s3751_s6 + $0xec] ss:$16 sps:$4 sm:$0xff]  }
 0x5ea   : > { %v1368_v4 = vmul.f32 1.442695, %v1365_v3  ;;  %2602 = vmatprep.subr.bf16.mxu0 %v3337_v52 }
 0x5ec   : > { %2883 = vpow2.f32 %v1368_v4 }
 0x5ed   : > { %v2876_v6 = vpop.eup %2875  ;;  %2885 = vpow2.f32 %v1366_v5  ;;  %2603 = vmatpush3.bf16.msra.mxu0 %v2799_v40 }
 0x5ee   : > { %v1127_v20 = vsel %vm867_vm2, %v2876_v6, 0.0  ;;  %2604 = vmatprep.subr.bf16.mxu0 %v3337_v52 }
 0x5f1   : > { %v2878_v8 = vpop.eup %2877  ;;  %2605 = vmatpush3.bf16.msra.mxu0 %v2800_v51  ;;  %v2820_v51 = vld [vmem:[%s3751_s6 + $0xac] ss:$16 sps:$4 sm:$0xff]  }
 0x5f2   : > { %v2880_v12 = vpop.eup %2879  ;;  %v1250_v13 = vsel %vm867_vm2, %v2878_v8, 0.0  ;;  %2606 = vmatprep.subr.bf16.mxu0 %v3337_v52 }
 0x5f3   : > { %1251 = vadd.xlane.f32.xlu0 %v1250_v13  ;;  %v1133_v14 = vpack.c.bf16 %v2880_v12, %v2876_v6  ;;  %v1130_v25 = vsel %vm867_vm2, %v2880_v12, 0.0 }
 0x5f5   : > { %v2882_v15 = vpop.eup %2881  ;;  %2567 = vmatmul.mubr.msk.bf16.vlgmr.msra.gmra.mxu1 %vm867_vm2, %v1133_v14  ;;  %2607 = vmatpush3.bf16.msra.mxu0 %v2801_v55  ;;  %v2823_v55 = vld [vmem:[%s3751_s6 + $0x84] ss:$16 sps:$4 sm:$0xff]  }
 0x5f6   : > { %2577 = vmatpush3.bf16.msra.mxu1 %v1258_v16  ;;  %v1253_v17 = vsel %vm867_vm2, %v2882_v15, 0.0  ;;  %2578 = vmatprep.mubr.msk.bf16.mxu1 %vm3338_vm0, %v3337_v52  ;;  %v1256_v23 = vpack.c.bf16 %v2882_v15, %v2878_v8 }
 0x5f7   : > { %1254 = vadd.xlane.f32.xlu0 %v1253_v17  ;;  %2588 = vmatprep.subr.bf16.mxu1 %v3337_v52 }
 0x5f8   : > { %2608 = vmatprep.subr.bf16.mxu0 %v3337_v52 }
 0x5f9   : > { %v2884_v19 = vpop.eup %2883  ;;  %2609 = vmatpush3.bf16.msra.mxu0 %v2802_v0  ;;  %v2835_v0 = vld [vmem:[%s3751_s6 + $0x44] ss:$16 sps:$4 sm:$0xff]  }
 0x5fa   : > { %v1373_v21 = vsel %vm867_vm2, %v2884_v19, 0.0  ;;  %v2886_v26 = vpop.eup %2885  ;;  %1820 = vmatprep.subr.bf16.mxu0 %v2808_v11  ;;  %v2859_v11 = vld [vmem:[%s3753_s19 + $0x58] sm:$0xff]  }
 0x5fb   : > { %1128 = vadd.xlane.f32.xlu0 %v1127_v20  ;;  %1374 = vadd.xlane.f32.xlu1 %v1373_v21  ;;  %v1370_v27 = vsel %vm867_vm2, %v2886_v26, 0.0  ;;  %v1376_v28 = vpack.c.bf16 %v2884_v19, %v2886_v26 }
 0x5fd   : > { %2579 = vmatmul.mubr.msk.bf16.vlgmr.msra.gmra.mxu1 %vm867_vm2, %v1256_v23 }
 0x5fe   : > { %2589 = vmatpush3.bf16.msra.mxu1 %v1258_v16  ;;  %2590 = vmatprep.mubr.msk.bf16.mxu1 %vm3338_vm0, %v3337_v52 }
 0x5ff   : > { %1131 = vadd.xlane.f32.xlu0 %v1130_v25 }
 0x603   : > { %1371 = vadd.xlane.f32.xlu0 %v1370_v27 }
 0x605   : > { %2591 = vmatmul.mubr.msk.bf16.vlgmr.msra.gmra.mxu1 %vm867_vm2, %v1376_v28 }
 0x606   : > { %1809 = vmatprep.mubr.bf16.mxu1 %v3332_v24 }
 0x607   : > { %1006 = vadd.xlane.f32.xlu0 %v1005_v29 }
 0x60b   : > { %1009 = vadd.xlane.f32.xlu0 %v1008_v30 }
 0x67c   : > { %v1252_v10 = vpop.xlane.xlu0 %1251 }
 0x680   : > { %v1255_v35 = vpop.xlane.xlu0 %1254 }
 0x684   : > { %v1129_v37 = vpop.xlane.xlu0 %1128  ;;  %v1375_v44 = vpop.xlane.xlu1 %1374 }
 0x685   : > { %2887 = vrcp.f32 %v1129_v37  ;;  %v2805_v37 = vld [vmem:[%s3751_s6 + $0xe4] ss:$16 sps:$4 sm:$0xff]  }
 0x686   : > { %1777 = vmatprep.subr.bf16.mxu1 %v2805_v37  ;;  %v2857_v37 = vld [vmem:[%s3753_s19 + $0x60] sm:$0xff]  }
 0x688   : > { %v1132_v38 = vpop.xlane.xlu0 %1131 }
 0x689   : > { %2889 = vrcp.f32 %v1132_v38  ;;  %v2806_v38 = vld [vmem:[%s3751_s6 + $0xe8] ss:$16 sps:$4 sm:$0xff]  }
 0x68a   : > { %2891 = vrcp.f32 %v1252_v10 }
 0x68b   : > { %2893 = vrcp.f32 %v1255_v35 }
 0x68c   : > { %v1372_v46 = vpop.xlane.xlu0 %1371  ;;  %2895 = vrcp.f32 %v1375_v44 }
 0x68d   : > { %2897 = vrcp.f32 %v1372_v46  ;;  %v2811_v46 = vld [vmem:[%s3751_s6 + $0xc4] ss:$16 sps:$4 sm:$0xff]  }
 0x690   : > { %v1007_v52 = vpop.xlane.xlu0 %1006 }
 0x691   : > { %2899 = vrcp.f32 %v1007_v52 }
 0x692   : > { %v2888_v43 = vpop.eup %2887 }
 0x694   : > { %v1010_v13 = vpop.xlane.xlu0 %1009 }
 0x695   : > { %2901 = vrcp.f32 %v1010_v13 }
 0x696   : > { %v2890_v45 = vpop.eup %2889 }
 0x697   : > { %v2892_v59 = vpop.eup %2891 }
 0x698   : > { %v2894_v60 = vpop.eup %2893 }
 0x699   : > { %v2896_v3 = vpop.eup %2895 }
 0x69a   : > { %v2898_v32 = vpop.eup %2897 }
 0x69e   : > { %v2900_v15 = vpop.eup %2899 }
 0x69f   : > { %v1061_v25 = vmul.f32 %v2900_v15, %v3917_v18 }
 0x6a2   : > { %v2902_v17 = vpop.eup %2901 }
 0x6a3   : > { %v1063_v26 = vmul.f32 %v2902_v17, %v3919_v22  ;;  %v2803_v22 = vld [vmem:[%s3751_s6 + $0xe0] ss:$16 sps:$4 sm:$0xff]  }
 0x6a4   : > { %1778 = vmatpush1.bf16.msra.mxu1 %v2803_v22  ;;  %v2856_v22 = vld [vmem:[%s3753_s19 + $0x28] sm:$0xff]  }
 0x6a5   : > { %1779 = vmatprep.subr.bf16.mxu1 %v2811_v46  ;;  %v2866_v46 = vld [vmem:[%s3753_s19] sm:$0xff]  }
 0x6b5   : > { %v1171_v41 = vpop.f32.mrf.mxu1 }
 0x6b6   : > { %v1179_v48 = vmul.f32 %v2888_v43, %v1171_v41 }
 0x6b7   : > { %v2568_v42 = vpop.f32.mrf.mxu1 }
 0x6b9   : > { %v1174_v47 = vpop.f32.mrf.mxu1 }
 0x6ba   : > { %v1181_v50 = vmul.f32 %v2890_v45, %v1174_v47  ;;  %v2814_v47 = vld [vmem:[%s3751_s6 + $0xcc] ss:$16 sps:$4 sm:$0xff]  }
 0x6bb   : > { %v2569_v53 = vpop.f32.mrf.mxu1 }
 0x6bc   : > { %v2756_v54 = vpack.i.bf16 %v1181_v50, %v1179_v48  ;;  %v2809_v48 = vld [vmem:[%s3751_s6 + $0xc0] ss:$16 sps:$4 sm:$0xff]   ;;  %v2812_v50 = vld [vmem:[%s3751_s6 + $0xc8] ss:$16 sps:$4 sm:$0xff]  }
 0x6bd   : > { %v1297_v57 = vpop.f32.mrf.mxu1  ;;  %1780 = vmatpush1.bf16.msra.mxu1 %v2809_v48  ;;  %v2815_v53 = vld [vmem:[%s3751_s6 + $0xa0] ss:$16 sps:$4 sm:$0xff]  }
 0x6be   : > { %2757 = vrot.lane.b32.xlu0 %v2756_v54, %s3340_s12  ;;  %v1305_v62 = vmul.f32 %v2892_v59, %v1297_v57  ;;  %v2818_v54 = vld [vmem:[%s3751_s6 + $0xa8] ss:$16 sps:$4 sm:$0xff]   ;;  %v2826_v57 = vld [vmem:[%s3751_s6 + $0x8c] ss:$16 sps:$4 sm:$0xff]  }
 0x6bf   : > { %v2580_v58 = vpop.f32.mrf.mxu1  ;;  %v2824_v59 = vld [vmem:[%s3751_s6 + $0x88] ss:$16 sps:$4 sm:$0xff]  }
 0x6c0   : > { %v2821_v58 = vld [vmem:[%s3751_s6 + $0x80] ss:$16 sps:$4 sm:$0xff]  }
 0x6c1   : > { %v1300_v61 = vpop.f32.mrf.mxu1 }
 0x6c2   : > { %v1307_v63 = vmul.f32 %v2894_v60, %v1300_v61  ;;  %v2829_v60 = vld [vmem:[%s3751_s6 + $0x64] ss:$16 sps:$4 sm:$0xff]   ;;  %v2832_v61 = vld [vmem:[%s3751_s6 + $0x6c] ss:$16 sps:$4 sm:$0xff]  }
 0x6c3   : > { %v2581_v56 = vpop.f32.mrf.mxu1 }
 0x6c4   : > { %v2761_v49 = vpack.i.bf16 %v1307_v63, %v1305_v62  ;;  %v2827_v62 = vld [vmem:[%s3751_s6 + $0x60] ss:$16 sps:$4 sm:$0xff]   ;;  %v2830_v63 = vld [vmem:[%s3751_s6 + $0x68] ss:$16 sps:$4 sm:$0xff]   ;;  %v2838_v56 = vld [vmem:[%s3751_s6 + $0x4c] ss:$16 sps:$4 sm:$0xff]  }
 0x6c5   : > { %v1414_v1 = vpop.f32.mrf.mxu1 }
 0x6c6   : > { %2762 = vrot.lane.b32.xlu0 %v2761_v49, %s3341_s11  ;;  %v1422_v5 = vmul.f32 %v2898_v32, %v1414_v1  ;;  %v2833_v49 = vld [vmem:[%s3751_s6 + $0x40] ss:$16 sps:$4 sm:$0xff]   ;;  %v2836_v1 = vld [vmem:[%s3751_s6 + $0x48] ss:$16 sps:$4 sm:$0xff]  }
 0x6c7   : > { %v2592_v2 = vpop.f32.mrf.mxu1  ;;  %v2839_v32 = vld [vmem:[%s3751_s6 + $0x20] ss:$16 sps:$4 sm:$0xff]  }
 0x6c8   : > { %v2841_v2 = vld [vmem:[%s3751_s6 + $0x24] ss:$16 sps:$4 sm:$0xff]  }
 0x6c9   : > { %v1417_v4 = vpop.f32.mrf.mxu1 }
 0x6ca   : > { %v1424_v6 = vmul.f32 %v2896_v3, %v1417_v4  ;;  %v2844_v3 = vld [vmem:[%s3751_s6 + $0x2c] ss:$16 sps:$4 sm:$0xff]   ;;  %v2842_v4 = vld [vmem:[%s3751_s6 + $0x28] ss:$16 sps:$4 sm:$0xff]  }
 0x6cb   : > { %v2593_v8 = vpop.f32.mrf.mxu1 }
 0x6cc   : > { %v2766_v12 = vpack.i.bf16 %v1424_v6, %v1422_v5  ;;  %v2847_v5 = vld [vmem:[%s3751_s6 + $0x4] ss:$16 sps:$4 sm:$0xff]   ;;  %v2850_v6 = vld [vmem:[%s3751_s6 + $0xc] ss:$16 sps:$4 sm:$0xff]   ;;  %v2845_v8 = vld [vmem:[%s3751_s6] ss:$16 sps:$4 sm:$0xff]  }
 0x6ce   : > { %2767 = vrot.lane.b32.xlu1 %v2766_v12, %s3339_s17  ;;  %v2848_v12 = vld [vmem:[%s3751_s6 + $0x8] ss:$16 sps:$4 sm:$0xff]  }
 0x730   : > { %v2758_v14 = vpop.permute.xlu0 %2757 }
 0x731   : > { %v2760_v19 = vunpack.i.h.bf16 %v2758_v14  ;;  %v2759_v20 = vunpack.i.l.bf16 %v2758_v14 }
 0x733   : > { %v1450_v28 = vsel %vm942_vm4, %v1063_v26, %v2760_v19  ;;  %v1449_v29 = vsel %vm942_vm4, %v1061_v25, %v2759_v20  ;;  %v1562_v19 = vld [vmem:[%s538_s21] sm:$0x1] }
 0x734   : > { %v1577_v20 = vunpack.c.l.bf16 %v1562_v19 }
 0x738   : > { %v2763_v16 = vpop.permute.xlu0 %2762 }
 0x739   : > { %v2765_v21 = vunpack.i.h.bf16 %v2763_v16  ;;  %v2764_v23 = vunpack.i.l.bf16 %v2763_v16 }
 0x73b   : > { %v1452_v33 = vsel %vm924_vm5, %v1450_v28, %v2765_v21  ;;  %v1451_v34 = vsel %vm924_vm5, %v1449_v29, %v2764_v23  ;;  %v1580_v21 = vsub.s32 1, %v3801_v36 }
 0x73d   : > { %v1581_v26 = vrot.slane %v1577_v20, %v1580_v21 }
 0x740   : > { %v2768_v27 = vpop.permute.xlu1 %2767 }
 0x741   : > { %v2770_v30 = vunpack.i.h.bf16 %v2768_v27  ;;  %v2769_v31 = vunpack.i.l.bf16 %v2768_v27 }
 0x743   : > { %v1455_v10 = vsel %vm1453_vm8, %v1452_v33, %v2770_v30  ;;  %v1454_v35 = vsel %vm1453_vm8, %v1451_v34, %v2769_v31  ;;  %v2851_v33 = vld [vmem:[%s3753_s19 + $0x78] sm:$0xff]  }
 0x744   : > { %v1456_v18 = vpack.c.bf16 %v1455_v10, %v1454_v35  ;;  %v2852_v34 = vld [vmem:[%s3753_s19 + $0x38] sm:$0xff]   ;;  %v2853_v10 = vld [vmem:[%s3753_s19 + $0x70] sm:$0xff]  }
 0x745   : > { %v2854_v35 = vld [vmem:[%s3753_s19 + $0x30] sm:$0xff]  }
 0x746   : > { %2611 = vmatmul.mubr.bf16.vlgmr.msra.gmra.mxu0 %v1456_v18  ;;  %v2855_v18 = vld [vmem:[%s3753_s19 + $0x68] sm:$0xff]  }
 0x747   : > { %1852 = vmatprep.mubr.bf16.mxu0 %v3332_v24  ;;  %1821 = vmatpush1.bf16.msra.mxu0 %v2806_v38  ;;  %v2858_v38 = vld [vmem:[%s3753_s19 + $0x20] sm:$0xff]  }
 0x748   : > { %1822 = vmatprep.subr.bf16.mxu0 %v2814_v47 }
 0x74b   : > { %1823 = vmatpush1.bf16.msra.mxu0 %v2812_v50 }
 0x74c   : > { %1824 = vmatprep.subr.bf16.mxu0 %v2820_v51 }
 0x74f   : > { %1825 = vmatpush1.bf16.msra.mxu0 %v2818_v54 }
 0x750   : > { %1826 = vmatprep.subr.bf16.mxu0 %v2826_v57 }
 0x753   : > { %1827 = vmatpush1.bf16.msra.mxu0 %v2824_v59 }
 0x754   : > { %1828 = vmatprep.subr.bf16.mxu0 %v2832_v61 }
 0x757   : > { %1829 = vmatpush1.bf16.msra.mxu0 %v2830_v63 }
 0x758   : > { %1830 = vmatprep.subr.bf16.mxu0 %v2838_v56 }
 0x75b   : > { %1831 = vmatpush1.bf16.msra.mxu0 %v2836_v1 }
 0x75c   : > { %1832 = vmatprep.subr.bf16.mxu0 %v2844_v3 }
 0x75f   : > { %1833 = vmatpush1.bf16.msra.mxu0 %v2842_v4 }
 0x760   : > { %1834 = vmatprep.subr.bf16.mxu0 %v2850_v6 }
 0x763   : > { %1835 = vmatpush1.bf16.msra.mxu0 %v2848_v12 }
 0x806   : > { %v1555_v40 = vpop.f32.mrf.mxu0 }
 0x807   : > { %v3996_v41 = vadd.f32 %v1555_v40, %v3776_v7  ;;  %v2860_v40 = vld [vmem:[%s3753_s19 + $0x18] sm:$0xff]  }
 0x808   : > { %v2612_v42 = vpop.f32.mrf.mxu0 }
 0x809   : > { %2068 = vst [vmem:[#allocation3 + $0x8] sm:$0xff] %v3996_v41  ;;  %v1563_v24 = vmul.f32 %v3996_v41, %v3996_v41  ;;  %v2861_v42 = vld [vmem:[%s3753_s19 + $0x50] sm:$0xff]  }
 0x80a   : > { %v1558_v43 = vpop.f32.mrf.mxu0 }
 0x80b   : > { %v4002_v44 = vadd.f32 %v1558_v43, %v3778_v9  ;;  %1565 = vadd.xlane.f32.xlu0 %v1563_v24  ;;  %v2817_v9 = vld [vmem:[%s3751_s6 + $0xa4] ss:$16 sps:$4 sm:$0xff]   ;;  %v2863_v43 = vld [vmem:[%s3753_s19 + $0x48] sm:$0xff]  }
 0x80c   : > { %v2613_v45 = vpop.f32.mrf.mxu0  ;;  %1781 = vmatprep.subr.bf16.mxu1 %v2817_v9  ;;  %v2862_v24 = vld [vmem:[%s3753_s19 + $0x10] sm:$0xff]  }
 0x80d   : > { %2069 = vst [vmem:[#allocation3] sm:$0xff] %v4002_v44  ;;  %v1564_v7 = vmul.f32 %v4002_v44, %v4002_v44  ;;  %1782 = vmatpush1.bf16.msra.mxu1 %v2815_v53  ;;  %v2864_v45 = vld [vmem:[%s3753_s19 + $0x8] sm:$0xff]  }
 0x80e   : > { %1783 = vmatprep.subr.bf16.mxu1 %v2823_v55 }
 0x80f   : > { %1567 = vadd.xlane.f32.xlu1 %v1564_v7  ;;  %v2865_v7 = vld [vmem:[%s3753_s19 + $0x40] sm:$0xff]  }
 0x811   : > { %1784 = vmatpush1.bf16.msra.mxu1 %v2821_v58 }
 0x812   : > { %1785 = vmatprep.subr.bf16.mxu1 %v2829_v60 }
 0x815   : > { %1786 = vmatpush1.bf16.msra.mxu1 %v2827_v62 }
 0x816   : > { %1787 = vmatprep.subr.bf16.mxu1 %v2835_v0 }
 0x819   : > { %1788 = vmatpush1.bf16.msra.mxu1 %v2833_v49 }
 0x81a   : > { %1789 = vmatprep.subr.bf16.mxu1 %v2841_v2 }
 0x81d   : > { %1790 = vmatpush1.bf16.msra.mxu1 %v2839_v32 }
 0x81e   : > { %1791 = vmatprep.subr.bf16.mxu1 %v2847_v5 }
 0x821   : > { %1792 = vmatpush1.bf16.msra.mxu1 %v2845_v8 }
 0x822   : > { %2524 = vmatprep.subr.bf16.mxu1 %v2851_v33 }
 0x894   : > { %v1566_v52 = vpop.xlane.xlu0 %1565 }
 0x895   : > { %v1569_v13 = vmul.f32 0.0078125, %v1566_v52 }
 0x897   : > { %v1571_v14 = vadd.f32 1e-05, %v1569_v13 }
 0x898   : > { %v1568_v15 = vpop.xlane.xlu1 %1567 }
 0x899   : > { %2903 = vrsqrt.f32 %v1571_v14  ;;  %v1570_v16 = vmul.f32 0.0078125, %v1568_v15 }
 0x89b   : > { %v1572_v17 = vadd.f32 1e-05, %v1570_v16 }
 0x89d   : > { %2905 = vrsqrt.f32 %v1572_v17 }
 0x8a6   : > { %v2904_v23 = vpop.eup %2903 }
 0x8a7   : > { %v1575_v25 = vmul.f32 %v2904_v23, %v3996_v41 }
 0x8a9   : > { %v1582_v29 = vmul.f32 %v1581_v26, %v1575_v25 }
 0x8aa   : > { %v2906_v27 = vpop.eup %2905 }
 0x8ab   : > { %v1576_v28 = vmul.f32 %v2906_v27, %v4002_v44 }
 0x8ad   : > { %v1583_v30 = vmul.f32 %v1581_v26, %v1576_v28 }
 0x8af   : > { %v1584_v31 = vpack.c.bf16 %v1583_v30, %v1582_v29 }
 0x8b1   : > { %1810 = vmatmul.mubr.bf16.vlgmr.msra.gmra.mxu1 %v1584_v31  ;;  %1853 = vmatmul.mubr.bf16.vlgmr.msra.gmra.mxu0 %v1584_v31 }
 0x8b2   : > { %2525 = vmatpush3.bf16.msra.mxu1 %v2852_v34 }
 0x8b3   : > { %2526 = vmatprep.subr.bf16.mxu1 %v2853_v10 }
 0x8b6   : > { %2527 = vmatpush3.bf16.msra.mxu1 %v2854_v35 }
 0x8b7   : > { %2528 = vmatprep.subr.bf16.mxu1 %v2855_v18 }
 0x8ba   : > { %2529 = vmatpush3.bf16.msra.mxu1 %v2856_v22 }
 0x8bb   : > { %2530 = vmatprep.subr.bf16.mxu1 %v2857_v37 }
 0x8be   : > { %2531 = vmatpush3.bf16.msra.mxu1 %v2858_v38 }
 0x8bf   : > { %2532 = vmatprep.subr.bf16.mxu1 %v2859_v11 }
 0x8c2   : > { %2533 = vmatpush3.bf16.msra.mxu1 %v2860_v40 }
 0x8c3   : > { %2534 = vmatprep.subr.bf16.mxu1 %v2861_v42 }
 0x8c6   : > { %2535 = vmatpush3.bf16.msra.mxu1 %v2862_v24 }
 0x8c7   : > { %2536 = vmatprep.subr.bf16.mxu1 %v2863_v43 }
 0x8ca   : > { %2537 = vmatpush3.bf16.msra.mxu1 %v2864_v45 }
 0x8cb   : > { %2538 = vmatprep.subr.bf16.mxu1 %v2865_v7 }
 0x8ce   : > { %2539 = vmatpush3.bf16.msra.mxu1 %v2866_v46 }
 0x971   : > { %v1811_v47 = vpop.f32.mrf.mxu1  ;;  %v1854_v56 = vpop.f32.mrf.mxu0 }
 0x972   : > { %v2453_v48 = vmul.f32 -1.442695, %v1811_v47 }
 0x973   : > { %v1813_v50 = vpop.f32.mrf.mxu1  ;;  %v1856_v49 = vpop.f32.mrf.mxu0 }
 0x974   : > { %2907 = vpow2.f32 %v2453_v48  ;;  %v2454_v9 = vmul.f32 -1.442695, %v1813_v50 }
 0x975   : > { %v1815_v51 = vpop.f32.mrf.mxu1  ;;  %v1858_v32 = vpop.f32.mrf.mxu0 }
 0x976   : > { %2909 = vpow2.f32 %v2454_v9  ;;  %v2455_v53 = vmul.f32 -1.442695, %v1815_v51 }
 0x977   : > { %v1817_v54 = vpop.f32.mrf.mxu1  ;;  %v1860_v13 = vpop.f32.mrf.mxu0 }
 0x978   : > { %2911 = vpow2.f32 %v2455_v53  ;;  %v2456_v55 = vmul.f32 -1.442695, %v1817_v54 }
 0x97a   : > { %2913 = vpow2.f32 %v2456_v55 }
 0x981   : > { %v2908_v57 = vpop.eup %2907 }
 0x982   : > { %v1875_v59 = vadd.f32 1.0, %v2908_v57 }
 0x983   : > { %v2910_v58 = vpop.eup %2909 }
 0x984   : > { %v1876_v60 = vadd.f32 1.0, %v2910_v58 }
 0x985   : > { %v2912_v61 = vpop.eup %2911 }
 0x986   : > { %2915 = vrcp.f32 %v1876_v60  ;;  %v1877_v62 = vadd.f32 1.0, %v2912_v61 }
 0x987   : > { %v2914_v63 = vpop.eup %2913  ;;  %2917 = vrcp.f32 %v1875_v59 }
 0x988   : > { %2919 = vrcp.f32 %v1877_v62  ;;  %v1878_v0 = vadd.f32 1.0, %v2914_v63 }
 0x98a   : > { %2921 = vrcp.f32 %v1878_v0 }
 0x993   : > { %v2916_v1 = vpop.eup %2915 }
 0x994   : > { %v2918_v2 = vpop.eup %2917  ;;  %v1888_v4 = vmul.f32 %v2916_v1, %v1813_v50 }
 0x995   : > { %v2920_v3 = vpop.eup %2919  ;;  %v1887_v8 = vmul.f32 %v2918_v2, %v1811_v47 }
 0x996   : > { %v1889_v5 = vmul.f32 %v2920_v3, %v1815_v51  ;;  %v1892_v14 = vmul.f32 %v1888_v4, %v1856_v49 }
 0x997   : > { %v2922_v6 = vpop.eup %2921  ;;  %v1891_v16 = vmul.f32 %v1887_v8, %v1854_v56 }
 0x998   : > { %v1890_v12 = vmul.f32 %v2922_v6, %v1817_v54  ;;  %v1893_v52 = vmul.f32 %v1889_v5, %v1858_v32 }
 0x99a   : > { %v1894_v15 = vmul.f32 %v1890_v12, %v1860_v13  ;;  %v1895_v19 = vpack.c.bf16 %v1893_v52, %v1891_v16 }
 0x99c   : > { %v1896_v17 = vpack.c.bf16 %v1894_v15, %v1892_v14 }
 0x99e   : > { %2057 = vmatprep.mubr.bf16.mxu1 %v1896_v17 }
 0x99f   : > { %2058 = vmatmul.mubr.bf16.vlgmr.msra.gmra.mxu1 %v1895_v19 }
 0xa5f   : > { %v2540_v20 = vpop.f32.mrf.mxu1 }
 0xa61   : > { %v2541_v21 = vpop.f32.mrf.mxu1 }
 0xa62   : > { %v2542_v23 = vadd.f32 %v2541_v21, %v2540_v20 }
 0xa63   : > { %v2543_v25 = vpop.f32.mrf.mxu1 }
 0xa64   : > { %2066 = vst [vmem:[#allocation2] sm:$0xff] %v2542_v23  ;;  %2073 = sbr.rel (%p2473_p3) target bundleno = 2836 (0xb14), region = 112 }
 0xa65   : > { %v2544_v26 = vpop.f32.mrf.mxu1 }
 0xa66   : > { %v2545_v27 = vadd.f32 %v2544_v26, %v2543_v25 }
 0xa68   : > { %2067 = vst [vmem:[#allocation2 + $0x8] sm:$0xff] %v2545_v27 }
 0xa69   : > { %v2074_v28 = vadd.f32 %v2542_v23, %v3996_v41  ;;  %v2075_v29 = vadd.f32 %v2545_v27, %v4002_v44  ;;  %v2076_v37 = vld [vmem:[#allocation15] sm:$0x1] }
 0xa6a   : > { %v2091_v38 = vunpack.c.l.bf16 %v2076_v37 }
 0xa6b   : > { %v2077_v30 = vmul.f32 %v2074_v28, %v2074_v28  ;;  %v2078_v31 = vmul.f32 %v2075_v29, %v2075_v29 }
 0xa6c   : > { %v2095_v41 = vrot.slane %v2091_v38, %v688_v39 }
 0xa6d   : > { %2079 = vadd.xlane.f32.xlu0 %v2077_v30 }
 0xa71   : > { %2081 = vadd.xlane.f32.xlu0 %v2078_v31 }
 0xaf6   : > { %v2080_v33 = vpop.xlane.xlu0 %2079 }
 0xaf7   : > { %v2083_v34 = vmul.f32 0.0078125, %v2080_v33 }
 0xaf9   : > { %v2085_v10 = vadd.f32 1e-05, %v2083_v34 }
 0xafa   : > { %v2082_v35 = vpop.xlane.xlu0 %2081 }
 0xafb   : > { %2923 = vrsqrt.f32 %v2085_v10  ;;  %v2084_v18 = vmul.f32 0.0078125, %v2082_v35 }
 0xafd   : > { %v2086_v22 = vadd.f32 1e-05, %v2084_v18 }
 0xaff   : > { %2925 = vrsqrt.f32 %v2086_v22 }
 0xb08   : > { %v2924_v11 = vpop.eup %2923 }
 0xb09   : > { %v2089_v40 = vmul.f32 %v2924_v11, %v2074_v28 }
 0xb0b   : > { %v2096_v24 = vmul.f32 %v2095_v41, %v2089_v40 }
 0xb0c   : > { %v2926_v44 = vpop.eup %2925 }
 0xb0d   : > { %v2090_v42 = vmul.f32 %v2926_v44, %v2075_v29 }
 0xb0f   : > { %v2097_v43 = vmul.f32 %v2095_v41, %v2090_v42 }
 0xb11   : > { %v2497_v45 = vpack.c.bf16 %v2097_v43, %v2096_v24 }
 0xb13   : > { %2498 = vst [vmem:[#allocation21] sm:$0xff] %v2497_v45  }
 0xb14 PF: > { %s3342_s21 = smov [#allocation21]   ;;  %s2489_s29 = sshll.u32 %s3431_s27, 7 }
 0xb15   : > { %s2119_s15 = sshll.u32 %s3342_s21, 4  ;;  %p4214_p11 = scmp.eq.s32.totalorder %s3431_s27, 1  ;;  %s2120_s15 = int_to_ptr.vmem [resolvable:$true] %s2119_s15 }
 0xb16   : > { %s3197_s6 = scalar_lea.vmem %s2120_s15, 128  ;;  %p3204_p6 = scmp.lt.s32.totalorder %s2120_s15, %s2120_s15 }
 0xb17   : > { %p3198_p12 = scmp.ne.s32.totalorder %s2120_s15, %s3197_s6  ;;  %p3205_p5 = scmp.lt.s32.totalorder %s3197_s6, %s3197_s6 }
 0xb19   : > { %p3199_p4 = pnand %p3198_p12, %p4214_p11  ;;  %p3206_p1 = por %p3205_p5, %p3204_p6 }
 0xb1b   : > { %p3200_p2 = pneg %p3199_p4 }
 0xb1d   : > { %p3207_p7 = pnand %p3206_p1, %p3200_p2 }
 0xb1f   : > { %3210 = shalt.err (!%p3207_p7)
}
 0xb20   : > { %s3343_s14 = smov 4   ;;  %p4215_p8 = pmov %p4214_p11 }
 0xb21   : > { %s4216_s18 = sld [smem:[#allocation42_spill]]  ;;  %s2135_s25 = sshll.u32 %s3772_s26, 4  ;;  %s4078_s25 = int_to_ptr.vmem [resolvable:$true] %s2135_s25 }
 0xb22   : > { %s4217_s7 = sld [smem:[#allocation37_spill]]  ;;  %s2109_s28 = scalar_lea.sflag [#allocation23], %s3733_s23 }
 0xb23   : > { %s4218_s13 = sld [smem:[#allocation43_spill]]  ;;  %s3221_s17 = scalar_lea.vmem %s4078_s25, 128 }
 0xb24   : > { %p3222_p13 = scmp.ne.s32.totalorder %s4078_s25, %s3221_s17  ;;  %s3344_s12 = smov [#allocation22]  }
 0xb25   : > { %s3225_s21 = sshll.u32 %s3344_s12, 4  ;;  %s3226_s21 = int_to_ptr.vmem [resolvable:$false] %s3225_s21 }
 0xb26   : > { %p3228_p3 = scmp.lt.s32.totalorder %s4078_s25, %s3226_s21 }
 0xb27   : > { %2645 = dma.vmem_to_hbm [thread:$0]  (%p4215_p8), %s2120_s15, 128, %s4216_s18, [#allocation6], %s3341_s11, %s3341_s11, %s3343_s14  }
 0xb28   : > { %p4219_p0 = scmp.ne.s32.totalorder %s4217_s7, 0  ;;  %s3227_s15 = scalar_lea.vmem %s3226_s21, 256 }
 0xb29   : > { %s4075_s20 = scalar_lea.hbm %s4218_s13, %s2489_s29  ;;  %p3229_p12 = scmp.lt.s32.totalorder %s3227_s15, %s3221_s17 }
 0xb2a   : > { %p3223_p9 = pnand %p3222_p13, %p4219_p0 }
 0xb2b   : > { %p3230_p11 = por %p3229_p12, %p3228_p3 }
 0xb2c   : > { %p3224_p10 = pneg %p3223_p9 }
 0xb2e   : > { %p3231_p4 = pnand %p3230_p11, %p3224_p10 }
 0xb30   : > { %3234 = shalt.err (!%p3231_p4)
}
 0xb31   : > { %s3235_s26 = scalar_lea.hbm %s4075_s20, 128  ;;  %s3239_s6 = scalar_lea.hbm %s4218_s13, 256 }
 0xb32   : > { %p3236_p2 = scmp.ne.s32.totalorder %s4075_s20, %s3235_s26  ;;  %p3240_p1 = scmp.lt.s32.totalorder %s4075_s20, %s4218_s13 }
 0xb33   : > { %p3241_p7 = scmp.lt.s32.totalorder %s3239_s6, %s3235_s26 }
 0xb34   : > { %p3237_p6 = pnand %p3236_p2, %p4219_p0 }
 0xb35   : > { %p3242_p8 = por %p3241_p7, %p3240_p1 }
 0xb36   : > { %p3238_p5 = pneg %p3237_p6 }
 0xb38   : > { %p3243_p13 = pnand %p3242_p8, %p3238_p5 }
 0xb3a   : > { %3246 = shalt.err (!%p3243_p13)
}
 0xb3b   : > { %2646 = dma.vmem_to_hbm [thread:$0]  (%p4219_p0), %s4078_s25, 128, %s4075_s20, %s2109_s28, %s3341_s11, %s3341_s11, %s3343_s14  }
 0xb3c   : > { %p4220_p9 = scmp.eq.s32.totalorder %s3431_s27, 1 }
 0xb3e   : > { %3292 = dma.done.wait (%p4220_p9), [#allocation6], 128   ;;  %p4221_p10 = pmov %p4220_p9 }
 0xb40   : > { %3294 = vsyncadd (%p4221_p10), [#allocation6], 4294967168 }
 0xb41 PF: > { %s4222_s18 = sld [smem:[#allocation33_spill]]  ;;  %p4225_p12 = scmp.ge.s32.totalorder %s3313_s24, 2 }
 0xb42   : > { %s4223_s16 = sld [smem:[#allocation38_spill]] }
 0xb47   : > { %s2154_s1 = sand.u32 1, %s4222_s18  }
 0xb48   : > { %p4224_p3 = scmp.ne.s32.totalorder %s4223_s16, 0  ;;  %s2155_s7 = scalar_lea.sflag [#allocation23], %s2154_s1 }
 0xb4a   : > { %p2683_p11 = pnand %p4225_p12, %p4224_p3 }
 0xb4c   : > { %p2684_p4 = pneg %p2683_p11 }
 0xb4e   : > { %3296 = dma.done.wait (%p2684_p4), %s2155_s7, 128  }
 0xb4f   : > { %3298 = vsyncadd (%p2684_p4), %s2155_s7, 4294967168  ;;  %s4226_s24 = sld [smem:[#allocation35_spill]]  ;;  %s4229_s21 = smov %s3305_s22 }
 0xb50   : > { %s4227_s11 = sld [smem:[#allocation34_spill]] }
 0xb51   : > { %s4228_s23 = sld [smem:[#allocation36_spill]] }
 0xb55   : > { %p36_p0 = scmp.ge.s32.totalorder %s4226_s24, 4  }
 0xb56   : > { %s4230_s22 = smov %s4227_s11 }
 0xb57   :  { %38 = sbr.rel (!%p36_p0) target bundleno = 19 (0x13), region = 195 }
 0xb5c   :  { %2160 = vsyncpa [#allocation5], 1 }
 0xb5d   :  { %2162 = vsyncpa [#allocation5 + $0x1], 1 }
 0xb5e   :  { %2163 = vsyncpa [#allocation8], 1 }
 0xb5f   :  { %2165 = vsyncpa [#allocation8 + $0x1], 1 }
 0xb60   :  { %2166 = vsyncpa [#allocation11], 1 }
 0xb61   :  { %2168 = vsyncpa [#allocation11 + $0x1], 1 }
 0xb62   :  { %2169 = vsyncpa [#allocation14], 1 }
 0xb63   :  { %2171 = vsyncpa [#allocation14 + $0x1], 1 }
 0xb64   :  { %2172 = vsyncpa [#allocation17], 1 }
 0xb65   :  { %2173 = vsyncpa [#allocation20], 1 }
 0xb66   :  { %2174 = vsyncpa [#allocation6], 1 }
 0xb67   :  { %2176 = vsyncpa [#allocation6 + $0x1], 1 }
 0xb68   :  { %2177 = vsyncpa [#allocation23], 1 }
 0xb69   :  { %2179 = vsyncpa [#allocation23 + $0x1], 1 }

</bundles_post_ra>
